<compile_context>
chip_gen: v7x
topology: tpu7x:2x2x1
jax: 0.10.0
libtpu: 0.0.40
codegen_flags: <defaults>
</compile_context>

<pallas_src>
import functools

import jax
import jax.numpy as jnp
from jax.experimental import pallas as pl
from jax.experimental.pallas import tpu as pltpu

LN_EPS = 1e-5
NEG_INF = -1e30


def _round_up(x, m):
    return ((x + m - 1) // m) * m


# ----------------------------------------------------------------------------
# In-kernel helpers (elementwise / reductions only)
# ----------------------------------------------------------------------------
def _layernorm(v, w, b):
    v = v.astype(jnp.float32)
    mu = jnp.mean(v, axis=-1, keepdims=True)
    var = jnp.mean(jnp.square(v - mu), axis=-1, keepdims=True)
    return (v - mu) * jax.lax.rsqrt(var + LN_EPS) * w + b


def _erf_approx(x):
    # Abramowitz & Stegun 7.1.26 (max abs err ~1.5e-7); exp/mul/add only.
    ax = jnp.abs(x)
    t = 1.0 / (1.0 + 0.3275911 * ax)
    poly = ((((1.061405429 * t - 1.453152027) * t + 1.421413741) * t
             - 0.284496736) * t + 0.254829592) * t
    y = 1.0 - poly * jnp.exp(-ax * ax)
    return jnp.where(x >= 0, y, -y)


def _gelu_erf(x):
    # Matches torch nn.GELU default (erf form).
    return 0.5 * x * (1.0 + _erf_approx(x * 0.7071067811865476))


# ----------------------------------------------------------------------------
# Kernel 1: fused patch embedding + cls token + positional embedding
#   Patches are zero-padded wrapper-side to (B, S_pad, patch_dim) with row 0
#   (cls slot) and rows > N set to zero; `base` carries cls+pos / pos+bias / 0
#   rows so the kernel is one dense matmul + add.
# ----------------------------------------------------------------------------
def _patch_embed_kernel(x_ref, w_ref, base_ref, o_ref):
    o_ref[0] = (jnp.dot(x_ref[0], w_ref[...],
                        preferred_element_type=jnp.float32)
                + base_ref[0]).astype(o_ref.dtype)


def patch_embed_pallas(x_padded_bf16, w_bf16, base):
    B, S_pad, P = x_padded_bf16.shape
    D = w_bf16.shape[1]
    return pl.pallas_call(
        _patch_embed_kernel,
        out_shape=jax.ShapeDtypeStruct((B, S_pad, D), jnp.bfloat16),
        grid=(B,),
        in_specs=[
            pl.BlockSpec((1, S_pad, P), lambda b: (b, 0, 0)),
            pl.BlockSpec((P, D), lambda b: (0, 0)),
            pl.BlockSpec((1, S_pad, D), lambda b: (0, 0, 0)),
        ],
        out_specs=pl.BlockSpec((1, S_pad, D), lambda b: (b, 0, 0)),
        compiler_params=pltpu.CompilerParams(
            dimension_semantics=("parallel",)),
    )(x_padded_bf16, w_bf16, base)


# ----------------------------------------------------------------------------
# Kernel 2: pre-norm multi-head self-attention, grid = (batch tiles,)
#   out = x + bo + concat_h[ softmax((xn Wq_h)(xn Wk_h)^T) (xn Wv_h) ] Wo
#   Fused QKV projection, unrolled per-head softmax, fused output projection.
# ----------------------------------------------------------------------------
def attention_pallas(x, layer, num_heads, dim_head, s_valid):
    B, S_pad, D = x.shape
    inner = num_heads * dim_head
    scale = dim_head ** -0.5

    # Fold 1/sqrt(dh) into the q columns of the fused qkv weight (trace time).
    wqkv = layer["wqkv"]
    wqkv = jnp.concatenate([wqkv[:, :inner] * scale, wqkv[:, inner:]],
                           axis=1).astype(jnp.bfloat16)          # (D, 3*inner)
    wo = layer["wo"].astype(jnp.bfloat16)                        # (inner, D)

    TB = B if B <= 4 else 4          # batch tile (keep modest for v7x VMEM)
    grid_b = pl.cdiv(B, TB)

    def kernel(x_ref, ln1w_ref, ln1b_ref, wqkv_ref, wo_ref, bo_ref, o_ref):
        x_f = x_ref[...].astype(jnp.float32)                     # (TB, S, D)
        xn = _layernorm(x_f, ln1w_ref[...], ln1b_ref[...]).astype(jnp.bfloat16)

        # One lane-dense QKV matmul for the whole batch tile.
        qkv = jnp.dot(xn.reshape(TB * S_pad, D), wqkv_ref[...],
                      preferred_element_type=jnp.float32)        # (TB*S, 3*inner)
        qkv = qkv.astype(jnp.bfloat16).reshape(TB, S_pad, 3 * inner)

        # Mask padded key columns (valid keys are [0, s_valid)).
        kmask = jax.lax.broadcasted_iota(jnp.int32, (1, 1, S_pad), 2) < s_valid

        av_parts = []
        for h in range(num_heads):                               # static unroll
            lo = h * dim_head
            q = qkv[:, :, lo:lo + dim_head]
            k = qkv[:, :, inner + lo:inner + lo + dim_head]
            v = qkv[:, :, 2 * inner + lo:2 * inner + lo + dim_head]
            # Contract last axes directly (no explicit transpose of k).
            s = jnp.einsum('bqd,bkd->bqk', q, k,
                           preferred_element_type=jnp.float32)   # (TB, S, S)
            if S_pad > s_valid:
                s = jnp.where(kmask, s, NEG_INF)
            s = s - jnp.max(s, axis=-1, keepdims=True)
            p = jnp.exp(s)
            p = p * pl.reciprocal(jnp.sum(p, axis=-1, keepdims=True),
                                  approx=True)
            av_parts.append(
                jnp.einsum('bqk,bkd->bqd', p.astype(jnp.bfloat16), v,
                           preferred_element_type=jnp.float32))  # (TB, S, Dh)

        av = jnp.concatenate(av_parts, axis=-1).astype(jnp.bfloat16)  # (TB,S,inner)
        proj = jnp.dot(av.reshape(TB * S_pad, inner), wo_ref[...],
                       preferred_element_type=jnp.float32).reshape(TB, S_pad, D)
        o_ref[...] = (x_f + bo_ref[...] + proj).astype(o_ref.dtype)

    return pl.pallas_call(
        kernel,
        out_shape=jax.ShapeDtypeStruct((B, S_pad, D), jnp.bfloat16),
        grid=(grid_b,),
        in_specs=[
            pl.BlockSpec((TB, S_pad, D), lambda b: (b, 0, 0)),    # x
            pl.BlockSpec((1, D), lambda b: (0, 0)),               # ln1 w
            pl.BlockSpec((1, D), lambda b: (0, 0)),               # ln1 b
            pl.BlockSpec((D, 3 * inner), lambda b: (0, 0)),       # fused wqkv
            pl.BlockSpec((inner, D), lambda b: (0, 0)),           # wo
            pl.BlockSpec((1, D), lambda b: (0, 0)),               # bo
        ],
        out_specs=pl.BlockSpec((TB, S_pad, D), lambda b: (b, 0, 0)),
        compiler_params=pltpu.CompilerParams(
            dimension_semantics=("parallel",),
            vmem_limit_bytes=64 * 1024 * 1024),
    )(x, layer["ln1_w"], layer["ln1_b"], wqkv, wo, layer["bo"])


# ----------------------------------------------------------------------------
# Kernel 3: pre-norm MLP, tiled over rows and (when large) over linear_dim
#   out = x + b2 + sum_f gelu(xn W1[:,f] + b1[f]) W2[f,:]
# ----------------------------------------------------------------------------
def _mlp_kernel(x_ref, ln2w_ref, ln2b_ref, w1_ref, b1_ref, w2_ref, b2_ref,
                o_ref, xn_scr, acc_scr):
    f = pl.program_id(1)

    @pl.when(f == 0)
    def _():
        x = x_ref[...].astype(jnp.float32)                        # (TM, D)
        xn_scr[...] = _layernorm(x, ln2w_ref[...], ln2b_ref[...]).astype(
            jnp.bfloat16)
        acc_scr[...] = x + b2_ref[...]                            # residual + final bias

    h = jnp.dot(xn_scr[...], w1_ref[...],
                preferred_element_type=jnp.float32) + b1_ref[...]  # (TM, TF)
    h = _gelu_erf(h)
    acc_scr[...] += jnp.dot(h.astype(jnp.bfloat16), w2_ref[...],
                            preferred_element_type=jnp.float32)    # (TM, D)

    @pl.when(f == pl.num_programs(1) - 1)
    def _():
        o_ref[...] = acc_scr[...].astype(o_ref.dtype)


def mlp_pallas(x, layer):
    B, S_pad, D = x.shape
    M = B * S_pad
    F = layer["w1"].shape[1]

    TM = M if M <= 512 else 512                       # row tile
    TF = 512 if (F > 512 and F % 512 == 0) else F     # linear_dim tile

    x2 = x.reshape(M, D)
    w1 = layer["w1"].astype(jnp.bfloat16)
    w2 = layer["w2"].astype(jnp.bfloat16)

    out = pl.pallas_call(
        _mlp_kernel,
        out_shape=jax.ShapeDtypeStruct((M, D), jnp.bfloat16),
        grid=(pl.cdiv(M, TM), F // TF),
        in_specs=[
            pl.BlockSpec((TM, D), lambda m, f: (m, 0)),           # x rows
            pl.BlockSpec((1, D), lambda m, f: (0, 0)),            # ln2 w
            pl.BlockSpec((1, D), lambda m, f: (0, 0)),            # ln2 b
            pl.BlockSpec((D, TF), lambda m, f: (0, f)),           # w1 chunk
            pl.BlockSpec((1, TF), lambda m, f: (0, f)),           # b1 chunk
            pl.BlockSpec((TF, D), lambda m, f: (f, 0)),           # w2 chunk
            pl.BlockSpec((1, D), lambda m, f: (0, 0)),            # b2
        ],
        out_specs=pl.BlockSpec((TM, D), lambda m, f: (m, 0)),
        scratch_shapes=[pltpu.VMEM((TM, D), jnp.bfloat16),
                        pltpu.VMEM((TM, D), jnp.float32)],
        compiler_params=pltpu.CompilerParams(
            dimension_semantics=("parallel", "arbitrary"),
            vmem_limit_bytes=64 * 1024 * 1024),
    )(x2, layer["ln2_w"], layer["ln2_b"], w1, layer["b1"], w2, layer["b2"])
    return out.reshape(B, S_pad, D)


# ----------------------------------------------------------------------------
# Kernel 4: final LayerNorm + classifier head (lane-dense padded output)
# ----------------------------------------------------------------------------
def _head_kernel(x_ref, lnw_ref, lnb_ref, w_ref, b_ref, o_ref):
    xn = _layernorm(x_ref[...], lnw_ref[...], lnb_ref[...])
    o_ref[...] = jnp.dot(xn.astype(jnp.bfloat16), w_ref[...],
                         preferred_element_type=jnp.float32) + b_ref[...]


def head_pallas(x, ln_w, ln_b, fc_w, fc_b):
    B, D = x.shape
    n_classes = fc_w.shape[1]
    NP = _round_up(n_classes, 128)                     # lane-dense padded width
    w_pad = jnp.zeros((D, NP), jnp.float32).at[:, :n_classes].set(fc_w)
    w_pad = w_pad.astype(jnp.bfloat16)
    b_pad = jnp.zeros((1, NP), jnp.float32).at[:, :n_classes].set(fc_b)

    TBH = B if B <= 128 else 128                       # batch-row tile
    out = pl.pallas_call(
        _head_kernel,
        out_shape=jax.ShapeDtypeStruct((B, NP), jnp.float32),
        grid=(pl.cdiv(B, TBH),),
        in_specs=[
            pl.BlockSpec((TBH, D), lambda i: (i, 0)),
            pl.BlockSpec((1, D), lambda i: (0, 0)),
            pl.BlockSpec((1, D), lambda i: (0, 0)),
            pl.BlockSpec((D, NP), lambda i: (0, 0)),
            pl.BlockSpec((1, NP), lambda i: (0, 0)),
        ],
        out_specs=pl.BlockSpec((TBH, NP), lambda i: (i, 0)),
        compiler_params=pltpu.CompilerParams(
            dimension_semantics=("parallel",)),
    )(x, ln_w, ln_b, w_pad, b_pad)
    return out[:, :n_classes]


# ----------------------------------------------------------------------------
# Parameter init (deterministic, synthetic)
# ----------------------------------------------------------------------------
def init_params(key, *, patch_dim, dim, n_layers, num_heads, dim_head,
                linear_dim, n_classes, n_patches):
    inner = num_heads * dim_head
    keys = jax.random.split(key, 8 + n_layers)

    def nrm(k, shape, scale=0.02):
        return scale * jax.random.normal(k, shape, dtype=jnp.float32)

    params = {
        "patch_w": nrm(keys[0], (patch_dim, dim)),
        "patch_b": jnp.zeros((1, dim), jnp.float32),
        "cls_token": nrm(keys[1], (1, 1, dim), 1.0),
        "pos_emb": jax.random.uniform(keys[2], (1, n_patches + 1, dim),
                                      dtype=jnp.float32),
        "norm_w": jnp.ones((1, dim), jnp.float32),
        "norm_b": jnp.zeros((1, dim), jnp.float32),
        "fc_w": nrm(keys[3], (dim, n_classes)),
        "fc_b": jnp.zeros((1, n_classes), jnp.float32),
        "layers": [],
    }
    for li in range(n_layers):
        lk = jax.random.split(keys[8 + li], 4)
        params["layers"].append({
            "ln1_w": jnp.ones((1, dim), jnp.float32),
            "ln1_b": jnp.zeros((1, dim), jnp.float32),
            "wqkv": nrm(lk[0], (dim, 3 * inner)),
            "wo": nrm(lk[1], (inner, dim)),
            "bo": jnp.zeros((1, dim), jnp.float32),
            "ln2_w": jnp.ones((1, dim), jnp.float32),
            "ln2_b": jnp.zeros((1, dim), jnp.float32),
            "w1": nrm(lk[2], (dim, linear_dim)),
            "b1": jnp.zeros((1, linear_dim), jnp.float32),
            "w2": nrm(lk[3], (linear_dim, dim)),
            "b2": jnp.zeros((1, dim), jnp.float32),
        })
    return params


# ----------------------------------------------------------------------------
# Forward pass
# ----------------------------------------------------------------------------
def vit_forward(img, params, *, patch_size, num_heads, dim_head):
    B, C, H, W = img.shape
    p1, p2 = patch_size
    h, w = H // p1, W // p2
    N = h * w
    patch_dim = C * p1 * p2
    S = N + 1                              # cls token + patches
    S_pad = _round_up(S, 8)                # padded sequence (clean (8,128) tiles)
    D = params["patch_w"].shape[1]

    # Rearrange 'b c (h p1) (w p2) -> b (h w) (p1 p2 c)'  (pure layout glue, XLA)
    x = img.reshape(B, C, h, p1, w, p2)
    x = jnp.transpose(x, (0, 2, 4, 3, 5, 1))
    x = x.reshape(B, N, patch_dim)
    # Zero row 0 (cls slot) and S_pad - S trailing pad rows.
    x = jnp.pad(x, ((0, 0), (1, S_pad - S), (0, 0))).astype(jnp.bfloat16)

    # base: row 0 = cls + pos[0]; rows 1..N = pos[1..N] + patch bias; rest = 0.
    base = jnp.zeros((1, S_pad, D), jnp.float32)
    base = base.at[0, 0, :].set(params["cls_token"][0, 0] + params["pos_emb"][0, 0])
    base = base.at[0, 1:S, :].set(params["pos_emb"][0, 1:S] + params["patch_b"])

    # Fused: patch linear + cls-token + positional embedding (dropout p=0.0).
    tokens = patch_embed_pallas(x, params["patch_w"].astype(jnp.bfloat16), base)

    # Transformer encoder: per layer, attention kernel + MLP kernel.
    for layer in params["layers"]:
        tokens = attention_pallas(tokens, layer, num_heads, dim_head, S)
        tokens = mlp_pallas(tokens, layer)

    # cls token -> LayerNorm -> classifier head
    cls_out = tokens[:, 0]                                         # (B, dim) bf16
    return head_pallas(cls_out, params["norm_w"], params["norm_b"],
                       params["fc_w"], params["fc_b"])


if __name__ == "__main__":
    # Small, forward-consistent config
    image_size = (16, 16)
    patch_size = (4, 4)
    channels = 4
    n_classes = 10
    n_layers = 2
    dim = 32
    num_heads = 2
    dim_head = 16
    linear_dim = 64
    batch = 2

    n_patches = (image_size[0] // patch_size[0]) * (image_size[1] // patch_size[1])
    patch_dim = channels * patch_size[0] * patch_size[1]

    key = jax.random.PRNGKey(0)
    k_img, k_par = jax.random.split(key)
    img = jax.random.normal(
        k_img, (batch, channels, image_size[0], image_size[1]), dtype=jnp.float32
    )
    params = init_params(
        k_par, patch_dim=patch_dim, dim=dim, n_layers=n_layers,
        num_heads=num_heads, dim_head=dim_head, linear_dim=linear_dim,
        n_classes=n_classes, n_patches=n_patches,
    )

    fwd = jax.jit(functools.partial(
        vit_forward, patch_size=patch_size, num_heads=num_heads,
        dim_head=dim_head))
    out = fwd(img, params)
    out = jax.block_until_ready(out)
    assert out.shape == (batch, n_classes)
    print("KERNEL_OK")
</pallas_src>

<mosaic_0001>
module attributes {stable_mosaic.version = 11 : i64} {
  func.func @_patch_embed_kernel(%arg0: i32, %arg1: memref<1x24x64xbf16, #tpu.memory_space<vmem>>, %arg2: memref<64x32xbf16, #tpu.memory_space<vmem>>, %arg3: memref<1x24x32xf32, #tpu.memory_space<vmem>>, %arg4: memref<1x24x32xbf16, #tpu.memory_space<vmem>>) attributes {dimension_semantics = [#tpu.dimension_semantics<parallel>], iteration_bounds = array<i64: 2>, scalar_prefetch = 0 : i64, scratch_operands = 0 : i64, tpu.core_type = #tpu.core_type<tc>, window_params = [{transform_indices = @transform_0, window_bounds = array<i64: 1, 24, 64>}, {pipeline_mode = #tpu.pipeline_mode<synchronous>, transform_indices = @transform_1, window_bounds = array<i64: 64, 32>}, {pipeline_mode = #tpu.pipeline_mode<synchronous>, transform_indices = @transform_2, window_bounds = array<i64: 1, 24, 32>}, {transform_indices = @transform_3, window_bounds = array<i64: 1, 24, 32>}]} {
    %c0 = arith.constant 0 : index
    %c0_0 = arith.constant 0 : index
    %c0_1 = arith.constant 0 : index
    %0 = vector.load %arg1[%c0, %c0_0, %c0_1] : memref<1x24x64xbf16, #tpu.memory_space<vmem>>, vector<1x24x64xbf16>
    %1 = vector.shape_cast %0 : vector<1x24x64xbf16> to vector<24x64xbf16>
    %c0_2 = arith.constant 0 : index
    %c0_3 = arith.constant 0 : index
    %2 = vector.load %arg2[%c0_2, %c0_3] : memref<64x32xbf16, #tpu.memory_space<vmem>>, vector<64x32xbf16>
    %cst = arith.constant dense<0.000000e+00> : vector<24x32xf32>
    %3 = tpu.matmul %1, %2, %cst {dimension_numbers = #tpu.dot_dimension_numbers<[1], [0], [0], [1], [0, 0, 1, 1], [], []>} : vector<24x64xbf16>, vector<64x32xbf16>, vector<24x32xf32> -> vector<24x32xf32>
    %c0_4 = arith.constant 0 : index
    %c0_5 = arith.constant 0 : index
    %c0_6 = arith.constant 0 : index
    %4 = vector.load %arg3[%c0_4, %c0_5, %c0_6] : memref<1x24x32xf32, #tpu.memory_space<vmem>>, vector<1x24x32xf32>
    %5 = vector.shape_cast %4 : vector<1x24x32xf32> to vector<24x32xf32>
    %6 = arith.addf %3, %5 : vector<24x32xf32>
    %7 = arith.truncf %6 : vector<24x32xf32> to vector<24x32xbf16>
    %c0_7 = arith.constant 0 : index
    %c0_8 = arith.constant 0 : index
    %c0_9 = arith.constant 0 : index
    %8 = vector.load %arg4[%c0_7, %c0_8, %c0_9] : memref<1x24x32xbf16, #tpu.memory_space<vmem>>, vector<1x24x32xbf16>
    %9 = vector.shape_cast %8 : vector<1x24x32xbf16> to vector<24x32xbf16>
    %10 = vector.shape_cast %7 : vector<24x32xbf16> to vector<1x24x32xbf16>
    tpu.vector_store %arg4[%c0_7, %c0_8, %c0_9], %10 {strides = array<i32>} : memref<1x24x32xbf16, #tpu.memory_space<vmem>>, vector<1x24x32xbf16>,
    return
  }
  func.func @transform_0(%arg0: i32) -> (i32, i32, i32) {
    %c0_i32 = arith.constant 0 : i32
    %c0_i32_0 = arith.constant 0 : i32
    %c0_i32_1 = arith.constant 0 : i32
    return %arg0, %c0_i32, %c0_i32_0 : i32, i32, i32
  }
  func.func @transform_1(%arg0: i32) -> (i32, i32) {
    %c0_i32 = arith.constant 0 : i32
    %c0_i32_0 = arith.constant 0 : i32
    %c0_i32_1 = arith.constant 0 : i32
    return %c0_i32, %c0_i32_0 : i32, i32
  }
  func.func @transform_2(%arg0: i32) -> (i32, i32, i32) {
    %c0_i32 = arith.constant 0 : i32
    %c0_i32_0 = arith.constant 0 : i32
    %c0_i32_1 = arith.constant 0 : i32
    %c0_i32_2 = arith.constant 0 : i32
    return %c0_i32, %c0_i32_0, %c0_i32_1 : i32, i32, i32
  }
  func.func @transform_3(%arg0: i32) -> (i32, i32, i32) {
    %c0_i32 = arith.constant 0 : i32
    %c0_i32_0 = arith.constant 0 : i32
    %c0_i32_1 = arith.constant 0 : i32
    return %arg0, %c0_i32, %c0_i32_0 : i32, i32, i32
  }
}

module attributes {stable_mosaic.version = 11 : i64} {
  func.func @kernel(%arg0: i32, %arg1: memref<2x24x32xbf16, #tpu.memory_space<vmem>>, %arg2: memref<1x32xf32, #tpu.memory_space<vmem>>, %arg3: memref<1x32xf32, #tpu.memory_space<vmem>>, %arg4: memref<32x96xbf16, #tpu.memory_space<vmem>>, %arg5: memref<32x32xbf16, #tpu.memory_space<vmem>>, %arg6: memref<1x32xf32, #tpu.memory_space<vmem>>, %arg7: memref<2x24x32xbf16, #tpu.memory_space<vmem>>) attributes {dimension_semantics = [#tpu.dimension_semantics<parallel>], iteration_bounds = array<i64: 1>, scalar_prefetch = 0 : i64, scratch_operands = 0 : i64, tpu.core_type = #tpu.core_type<tc>, window_params = [{transform_indices = @transform_0, window_bounds = array<i64: 2, 24, 32>}, {pipeline_mode = #tpu.pipeline_mode<synchronous>, transform_indices = @transform_1, window_bounds = array<i64: 1, 32>}, {pipeline_mode = #tpu.pipeline_mode<synchronous>, transform_indices = @transform_2, window_bounds = array<i64: 1, 32>}, {pipeline_mode = #tpu.pipeline_mode<synchronous>, transform_indices = @transform_3, window_bounds = array<i64: 32, 96>}, {pipeline_mode = #tpu.pipeline_mode<synchronous>, transform_indices = @transform_4, window_bounds = array<i64: 32, 32>}, {pipeline_mode = #tpu.pipeline_mode<synchronous>, transform_indices = @transform_5, window_bounds = array<i64: 1, 32>}, {transform_indices = @transform_6, window_bounds = array<i64: 2, 24, 32>}]} {
    %c0 = arith.constant 0 : index
    %c0_0 = arith.constant 0 : index
    %c0_1 = arith.constant 0 : index
    %0 = vector.load %arg1[%c0, %c0_0, %c0_1] : memref<2x24x32xbf16, #tpu.memory_space<vmem>>, vector<2x24x32xbf16>
    %1 = arith.extf %0 : vector<2x24x32xbf16> to vector<2x24x32xf32>
    %c0_2 = arith.constant 0 : index
    %c0_3 = arith.constant 0 : index
    %2 = vector.load %arg2[%c0_2, %c0_3] : memref<1x32xf32, #tpu.memory_space<vmem>>, vector<1x32xf32>
    %c0_4 = arith.constant 0 : index
    %c0_5 = arith.constant 0 : index
    %3 = vector.load %arg3[%c0_4, %c0_5] : memref<1x32xf32, #tpu.memory_space<vmem>>, vector<1x32xf32>
    %cst = arith.constant dense<0.000000e+00> : vector<2x24xf32>
    %4 = vector.multi_reduction <add>, %1, %cst [2] : vector<2x24x32xf32> to vector<2x24xf32>
    %5 = vector.shape_cast %4 : vector<2x24xf32> to vector<2x24x1xf32>
    %cst_6 = arith.constant 3.200000e+01 : f32
    %6 = vector.broadcast %cst_6 : f32 to vector<2x24x1xf32>
    %7 = arith.divf %5, %6 : vector<2x24x1xf32>
    %8 = vector.broadcast %7 : vector<2x24x1xf32> to vector<2x24x32xf32>
    %9 = arith.subf %1, %8 : vector<2x24x32xf32>
    %10 = arith.mulf %9, %9 : vector<2x24x32xf32>
    %cst_7 = arith.constant dense<0.000000e+00> : vector<2x24xf32>
    %11 = vector.multi_reduction <add>, %10, %cst_7 [2] : vector<2x24x32xf32> to vector<2x24xf32>
    %12 = vector.shape_cast %11 : vector<2x24xf32> to vector<2x24x1xf32>
    %cst_8 = arith.constant 3.200000e+01 : f32
    %13 = vector.broadcast %cst_8 : f32 to vector<2x24x1xf32>
    %14 = arith.divf %12, %13 : vector<2x24x1xf32>
    %15 = vector.broadcast %7 : vector<2x24x1xf32> to vector<2x24x32xf32>
    %16 = arith.subf %1, %15 : vector<2x24x32xf32>
    %cst_9 = arith.constant 9.99999974E-6 : f32
    %17 = vector.broadcast %cst_9 : f32 to vector<2x24x1xf32>
    %18 = arith.addf %14, %17 : vector<2x24x1xf32>
    %19 = math.rsqrt %18 : vector<2x24x1xf32>
    %20 = vector.broadcast %19 : vector<2x24x1xf32> to vector<2x24x32xf32>
    %21 = arith.mulf %16, %20 : vector<2x24x32xf32>
    %22 = vector.shape_cast %2 : vector<1x32xf32> to vector<1x1x32xf32>
    %23 = vector.broadcast %22 : vector<1x1x32xf32> to vector<2x24x32xf32>
    %24 = arith.mulf %21, %23 : vector<2x24x32xf32>
    %25 = vector.shape_cast %3 : vector<1x32xf32> to vector<1x1x32xf32>
    %26 = vector.broadcast %25 : vector<1x1x32xf32> to vector<2x24x32xf32>
    %27 = arith.addf %24, %26 : vector<2x24x32xf32>
    %28 = arith.truncf %27 : vector<2x24x32xf32> to vector<2x24x32xbf16>
    %29 = vector.shape_cast %28 : vector<2x24x32xbf16> to vector<48x32xbf16>
    %c0_10 = arith.constant 0 : index
    %c0_11 = arith.constant 0 : index
    %30 = vector.load %arg4[%c0_10, %c0_11] : memref<32x96xbf16, #tpu.memory_space<vmem>>, vector<32x96xbf16>
    %cst_12 = arith.constant dense<0.000000e+00> : vector<48x96xf32>
    %31 = tpu.matmul %29, %30, %cst_12 {dimension_numbers = #tpu.dot_dimension_numbers<[1], [0], [0], [1], [0, 0, 1, 1], [], []>} : vector<48x32xbf16>, vector<32x96xbf16>, vector<48x96xf32> -> vector<48x96xf32>
    %32 = arith.truncf %31 : vector<48x96xf32> to vector<48x96xbf16>
    %33 = vector.shape_cast %32 : vector<48x96xbf16> to vector<2x24x96xbf16>
    %34 = tpu.iota {dimensions = array<i32: 2>} : vector<1x1x24xi32>
    %c17_i32 = arith.constant 17 : i32
    %35 = vector.broadcast %c17_i32 : i32 to vector<1x1x24xi32>
    %36 = arith.cmpi slt, %34, %35 : vector<1x1x24xi32>
    %37 = vector.extract_strided_slice %33 {offsets = [0, 0, 0], sizes = [2, 24, 16], strides = [1, 1, 1]} : vector<2x24x96xbf16> to vector<2x24x16xbf16>
    %38 = vector.extract_strided_slice %33 {offsets = [0, 0, 32], sizes = [2, 24, 16], strides = [1, 1, 1]} : vector<2x24x96xbf16> to vector<2x24x16xbf16>
    %39 = vector.extract_strided_slice %33 {offsets = [0, 0, 64], sizes = [2, 24, 16], strides = [1, 1, 1]} : vector<2x24x96xbf16> to vector<2x24x16xbf16>
    "tpu.trace_start"() <{level = 10 : i32, message = "bqd,bkd->bqk"}> : () -> ()
    %cst_13 = arith.constant dense<0.000000e+00> : vector<2x24x24xf32>
    %40 = tpu.matmul %37, %38, %cst_13 {dimension_numbers = #tpu.dot_dimension_numbers<[2], [2], [1], [1], [0, 0, 0, 1, 1, 1], [0], [0]>} : vector<2x24x16xbf16>, vector<2x24x16xbf16>, vector<2x24x24xf32> -> vector<2x24x24xf32>
    %cst_14 = arith.constant -1.000000e+30 : f32
    "tpu.trace_stop"() : () -> ()
    %41 = vector.shape_cast %36 : vector<1x1x24xi1> to vector<1x1x24xi1>
    %42 = vector.broadcast %41 : vector<1x1x24xi1> to vector<2x24x24xi1>
    %43 = vector.broadcast %cst_14 : f32 to vector<2x24x24xf32>
    %44 = arith.select %42, %40, %43 : vector<2x24x24xi1>, vector<2x24x24xf32>
    %cst_15 = arith.constant dense<0xFF800000> : vector<2x24xf32>
    %45 = vector.multi_reduction <maximumf>, %44, %cst_15 [2] : vector<2x24x24xf32> to vector<2x24xf32>
    %46 = vector.shape_cast %45 : vector<2x24xf32> to vector<2x24x1xf32>
    %47 = vector.broadcast %46 : vector<2x24x1xf32> to vector<2x24x24xf32>
    %48 = arith.subf %44, %47 : vector<2x24x24xf32>
    %49 = math.exp %48 : vector<2x24x24xf32>
    %cst_16 = arith.constant dense<0.000000e+00> : vector<2x24xf32>
    %50 = vector.multi_reduction <add>, %49, %cst_16 [2] : vector<2x24x24xf32> to vector<2x24xf32>
    %51 = vector.shape_cast %50 : vector<2x24xf32> to vector<2x24x1xf32>
    %52 = tpu.reciprocal %51 {approx = true} : vector<2x24x1xf32> -> vector<2x24x1xf32>
    %53 = vector.broadcast %52 : vector<2x24x1xf32> to vector<2x24x24xf32>
    %54 = arith.mulf %49, %53 : vector<2x24x24xf32>
    %55 = arith.truncf %54 : vector<2x24x24xf32> to vector<2x24x24xbf16>
    "tpu.trace_start"() <{level = 10 : i32, message = "bqk,bkd->bqd"}> : () -> ()
    %cst_17 = arith.constant dense<0.000000e+00> : vector<2x24x16xf32>
    %56 = tpu.matmul %55, %39, %cst_17 {dimension_numbers = #tpu.dot_dimension_numbers<[2], [1], [1], [2], [0, 0, 0, 1, 1, 2], [0], [0]>} : vector<2x24x24xbf16>, vector<2x24x16xbf16>, vector<2x24x16xf32> -> vector<2x24x16xf32>
    "tpu.trace_stop"() : () -> ()
    %57 = vector.extract_strided_slice %33 {offsets = [0, 0, 16], sizes = [2, 24, 16], strides = [1, 1, 1]} : vector<2x24x96xbf16> to vector<2x24x16xbf16>
    %58 = vector.extract_strided_slice %33 {offsets = [0, 0, 48], sizes = [2, 24, 16], strides = [1, 1, 1]} : vector<2x24x96xbf16> to vector<2x24x16xbf16>
    %59 = vector.extract_strided_slice %33 {offsets = [0, 0, 80], sizes = [2, 24, 16], strides = [1, 1, 1]} : vector<2x24x96xbf16> to vector<2x24x16xbf16>
    "tpu.trace_start"() <{level = 10 : i32, message = "bqd,bkd->bqk"}> : () -> ()
    %cst_18 = arith.constant dense<0.000000e+00> : vector<2x24x24xf32>
    %60 = tpu.matmul %57, %58, %cst_18 {dimension_numbers = #tpu.dot_dimension_numbers<[2], [2], [1], [1], [0, 0, 0, 1, 1, 1], [0], [0]>} : vector<2x24x16xbf16>, vector<2x24x16xbf16>, vector<2x24x24xf32> -> vector<2x24x24xf32>
    %cst_19 = arith.constant -1.000000e+30 : f32
    "tpu.trace_stop"() : () -> ()
    %61 = vector.shape_cast %36 : vector<1x1x24xi1> to vector<1x1x24xi1>
    %62 = vector.broadcast %61 : vector<1x1x24xi1> to vector<2x24x24xi1>
    %63 = vector.broadcast %cst_19 : f32 to vector<2x24x24xf32>
    %64 = arith.select %62, %60, %63 : vector<2x24x24xi1>, vector<2x24x24xf32>
    %cst_20 = arith.constant dense<0xFF800000> : vector<2x24xf32>
    %65 = vector.multi_reduction <maximumf>, %64, %cst_20 [2] : vector<2x24x24xf32> to vector<2x24xf32>
    %66 = vector.shape_cast %65 : vector<2x24xf32> to vector<2x24x1xf32>
    %67 = vector.broadcast %66 : vector<2x24x1xf32> to vector<2x24x24xf32>
    %68 = arith.subf %64, %67 : vector<2x24x24xf32>
    %69 = math.exp %68 : vector<2x24x24xf32>
    %cst_21 = arith.constant dense<0.000000e+00> : vector<2x24xf32>
    %70 = vector.multi_reduction <add>, %69, %cst_21 [2] : vector<2x24x24xf32> to vector<2x24xf32>
    %71 = vector.shape_cast %70 : vector<2x24xf32> to vector<2x24x1xf32>
    %72 = tpu.reciprocal %71 {approx = true} : vector<2x24x1xf32> -> vector<2x24x1xf32>
    %73 = vector.broadcast %72 : vector<2x24x1xf32> to vector<2x24x24xf32>
    %74 = arith.mulf %69, %73 : vector<2x24x24xf32>
    %75 = arith.truncf %74 : vector<2x24x24xf32> to vector<2x24x24xbf16>
    "tpu.trace_start"() <{level = 10 : i32, message = "bqk,bkd->bqd"}> : () -> ()
    %cst_22 = arith.constant dense<0.000000e+00> : vector<2x24x16xf32>
    %76 = tpu.matmul %75, %59, %cst_22 {dimension_numbers = #tpu.dot_dimension_numbers<[2], [1], [1], [2], [0, 0, 0, 1, 1, 2], [0], [0]>} : vector<2x24x24xbf16>, vector<2x24x16xbf16>, vector<2x24x16xf32> -> vector<2x24x16xf32>
    "tpu.trace_stop"() : () -> ()
    %77 = tpu.concatenate %56, %76 in 2 : vector<2x24x16xf32>, vector<2x24x16xf32> -> vector<2x24x32xf32>
    %78 = arith.truncf %77 : vector<2x24x32xf32> to vector<2x24x32xbf16>
    %79 = vector.shape_cast %78 : vector<2x24x32xbf16> to vector<48x32xbf16>
    %c0_23 = arith.constant 0 : index
    %c0_24 = arith.constant 0 : index
    %80 = vector.load %arg5[%c0_23, %c0_24] : memref<32x32xbf16, #tpu.memory_space<vmem>>, vector<32x32xbf16>
    %cst_25 = arith.constant dense<0.000000e+00> : vector<48x32xf32>
    %81 = tpu.matmul %79, %80, %cst_25 {dimension_numbers = #tpu.dot_dimension_numbers<[1], [0], [0], [1], [0, 0, 1, 1], [], []>} : vector<48x32xbf16>, vector<32x32xbf16>, vector<48x32xf32> -> vector<48x32xf32>
    %82 = vector.shape_cast %81 : vector<48x32xf32> to vector<2x24x32xf32>
    %c0_26 = arith.constant 0 : index
    %c0_27 = arith.constant 0 : index
    %83 = vector.load %arg6[%c0_26, %c0_27] : memref<1x32xf32, #tpu.memory_space<vmem>>, vector<1x32xf32>
    %84 = vector.shape_cast %83 : vector<1x32xf32> to vector<1x1x32xf32>
    %85 = vector.broadcast %84 : vector<1x1x32xf32> to vector<2x24x32xf32>
    %86 = arith.addf %1, %85 : vector<2x24x32xf32>
    %87 = arith.addf %86, %82 : vector<2x24x32xf32>
    %88 = arith.truncf %87 : vector<2x24x32xf32> to vector<2x24x32xbf16>
    %c0_28 = arith.constant 0 : index
    %c0_29 = arith.constant 0 : index
    %c0_30 = arith.constant 0 : index
    %89 = vector.load %arg7[%c0_28, %c0_29, %c0_30] : memref<2x24x32xbf16, #tpu.memory_space<vmem>>, vector<2x24x32xbf16>
    tpu.vector_store %arg7[%c0_28, %c0_29, %c0_30], %88 {strides = array<i32>} : memref<2x24x32xbf16, #tpu.memory_space<vmem>>, vector<2x24x32xbf16>,
    return
  }
  func.func @transform_0(%arg0: i32) -> (i32, i32, i32) {
    %c0_i32 = arith.constant 0 : i32
    %c0_i32_0 = arith.constant 0 : i32
    %c0_i32_1 = arith.constant 0 : i32
    return %arg0, %c0_i32, %c0_i32_0 : i32, i32, i32
  }
  func.func @transform_1(%arg0: i32) -> (i32, i32) {
    %c0_i32 = arith.constant 0 : i32
    %c0_i32_0 = arith.constant 0 : i32
    %c0_i32_1 = arith.constant 0 : i32
    return %c0_i32, %c0_i32_0 : i32, i32
  }
  func.func @transform_2(%arg0: i32) -> (i32, i32) {
    %c0_i32 = arith.constant 0 : i32
    %c0_i32_0 = arith.constant 0 : i32
    %c0_i32_1 = arith.constant 0 : i32
    return %c0_i32, %c0_i32_0 : i32, i32
  }
  func.func @transform_3(%arg0: i32) -> (i32, i32) {
    %c0_i32 = arith.constant 0 : i32
    %c0_i32_0 = arith.constant 0 : i32
    %c0_i32_1 = arith.constant 0 : i32
    return %c0_i32, %c0_i32_0 : i32, i32
  }
  func.func @transform_4(%arg0: i32) -> (i32, i32) {
    %c0_i32 = arith.constant 0 : i32
    %c0_i32_0 = arith.constant 0 : i32
    %c0_i32_1 = arith.constant 0 : i32
    return %c0_i32, %c0_i32_0 : i32, i32
  }
  func.func @transform_5(%arg0: i32) -> (i32, i32) {
    %c0_i32 = arith.constant 0 : i32
    %c0_i32_0 = arith.constant 0 : i32
    %c0_i32_1 = arith.constant 0 : i32
    return %c0_i32, %c0_i32_0 : i32, i32
  }
  func.func @transform_6(%arg0: i32) -> (i32, i32, i32) {
    %c0_i32 = arith.constant 0 : i32
    %c0_i32_0 = arith.constant 0 : i32
    %c0_i32_1 = arith.constant 0 : i32
    return %arg0, %c0_i32, %c0_i32_0 : i32, i32, i32
  }
}

module attributes {stable_mosaic.version = 11 : i64} {
  func.func @_mlp_kernel(%arg0: i32, %arg1: i32, %arg2: memref<48x32xbf16, #tpu.memory_space<vmem>>, %arg3: memref<1x32xf32, #tpu.memory_space<vmem>>, %arg4: memref<1x32xf32, #tpu.memory_space<vmem>>, %arg5: memref<32x64xbf16, #tpu.memory_space<vmem>>, %arg6: memref<1x64xf32, #tpu.memory_space<vmem>>, %arg7: memref<64x32xbf16, #tpu.memory_space<vmem>>, %arg8: memref<1x32xf32, #tpu.memory_space<vmem>>, %arg9: memref<48x32xbf16, #tpu.memory_space<vmem>>, %arg10: memref<48x32xbf16, #tpu.memory_space<vmem>>, %arg11: memref<48x32xf32, #tpu.memory_space<vmem>>) attributes {dimension_semantics = [#tpu.dimension_semantics<parallel>, #tpu.dimension_semantics<arbitrary>], iteration_bounds = array<i64: 1, 1>, scalar_prefetch = 0 : i64, scratch_operands = 2 : i64, tpu.core_type = #tpu.core_type<tc>, window_params = [{transform_indices = @transform_0, window_bounds = array<i64: 48, 32>}, {pipeline_mode = #tpu.pipeline_mode<synchronous>, transform_indices = @transform_1, window_bounds = array<i64: 1, 32>}, {pipeline_mode = #tpu.pipeline_mode<synchronous>, transform_indices = @transform_2, window_bounds = array<i64: 1, 32>}, {transform_indices = @transform_3, window_bounds = array<i64: 32, 64>}, {transform_indices = @transform_4, window_bounds = array<i64: 1, 64>}, {transform_indices = @transform_5, window_bounds = array<i64: 64, 32>}, {pipeline_mode = #tpu.pipeline_mode<synchronous>, transform_indices = @transform_6, window_bounds = array<i64: 1, 32>}, {transform_indices = @transform_7, window_bounds = array<i64: 48, 32>}]} {
    %c0_i32 = arith.constant 0 : i32
    %0 = arith.cmpi eq, %arg1, %c0_i32 : i32
    %1 = arith.extui %0 : i1 to i32
    %c0_i32_0 = arith.constant 0 : i32
    %2 = arith.cmpi ne, %1, %c0_i32_0 : i32
    scf.if %2 {
      %c0_30 = arith.constant 0 : index
      %c0_31 = arith.constant 0 : index
      %58 = vector.load %arg2[%c0_30, %c0_31] : memref<48x32xbf16, #tpu.memory_space<vmem>>, vector<48x32xbf16>
      %59 = arith.extf %58 : vector<48x32xbf16> to vector<48x32xf32>
      %c0_32 = arith.constant 0 : index
      %c0_33 = arith.constant 0 : index
      %60 = vector.load %arg3[%c0_32, %c0_33] : memref<1x32xf32, #tpu.memory_space<vmem>>, vector<1x32xf32>
      %c0_34 = arith.constant 0 : index
      %c0_35 = arith.constant 0 : index
      %61 = vector.load %arg4[%c0_34, %c0_35] : memref<1x32xf32, #tpu.memory_space<vmem>>, vector<1x32xf32>
      %cst_36 = arith.constant dense<0.000000e+00> : vector<48xf32>
      %62 = vector.multi_reduction <add>, %59, %cst_36 [1] : vector<48x32xf32> to vector<48xf32>
      %63 = vector.shape_cast %62 : vector<48xf32> to vector<48x1xf32>
      %cst_37 = arith.constant 3.200000e+01 : f32
      %64 = vector.broadcast %cst_37 : f32 to vector<48x1xf32>
      %65 = arith.divf %63, %64 : vector<48x1xf32>
      %66 = vector.broadcast %65 : vector<48x1xf32> to vector<48x32xf32>
      %67 = arith.subf %59, %66 : vector<48x32xf32>
      %68 = arith.mulf %67, %67 : vector<48x32xf32>
      %cst_38 = arith.constant dense<0.000000e+00> : vector<48xf32>
      %69 = vector.multi_reduction <add>, %68, %cst_38 [1] : vector<48x32xf32> to vector<48xf32>
      %70 = vector.shape_cast %69 : vector<48xf32> to vector<48x1xf32>
      %cst_39 = arith.constant 3.200000e+01 : f32
      %71 = vector.broadcast %cst_39 : f32 to vector<48x1xf32>
      %72 = arith.divf %70, %71 : vector<48x1xf32>
      %73 = vector.broadcast %65 : vector<48x1xf32> to vector<48x32xf32>
      %74 = arith.subf %59, %73 : vector<48x32xf32>
      %cst_40 = arith.constant 9.99999974E-6 : f32
      %75 = vector.broadcast %cst_40 : f32 to vector<48x1xf32>
      %76 = arith.addf %72, %75 : vector<48x1xf32>
      %77 = math.rsqrt %76 : vector<48x1xf32>
      %78 = vector.broadcast %77 : vector<48x1xf32> to vector<48x32xf32>
      %79 = arith.mulf %74, %78 : vector<48x32xf32>
      %80 = vector.broadcast %60 : vector<1x32xf32> to vector<48x32xf32>
      %81 = arith.mulf %79, %80 : vector<48x32xf32>
      %82 = vector.broadcast %61 : vector<1x32xf32> to vector<48x32xf32>
      %83 = arith.addf %81, %82 : vector<48x32xf32>
      %84 = arith.truncf %83 : vector<48x32xf32> to vector<48x32xbf16>
      %c0_41 = arith.constant 0 : index
      %c0_42 = arith.constant 0 : index
      %85 = vector.load %arg10[%c0_41, %c0_42] : memref<48x32xbf16, #tpu.memory_space<vmem>>, vector<48x32xbf16>
      tpu.vector_store %arg10[%c0_41, %c0_42], %84 {strides = array<i32>} : memref<48x32xbf16, #tpu.memory_space<vmem>>, vector<48x32xbf16>,
      %c0_43 = arith.constant 0 : index
      %c0_44 = arith.constant 0 : index
      %86 = vector.load %arg8[%c0_43, %c0_44] : memref<1x32xf32, #tpu.memory_space<vmem>>, vector<1x32xf32>
      %87 = vector.broadcast %86 : vector<1x32xf32> to vector<48x32xf32>
      %88 = arith.addf %59, %87 : vector<48x32xf32>
      %c0_45 = arith.constant 0 : index
      %c0_46 = arith.constant 0 : index
      %89 = vector.load %arg11[%c0_45, %c0_46] : memref<48x32xf32, #tpu.memory_space<vmem>>, vector<48x32xf32>
      tpu.vector_store %arg11[%c0_45, %c0_46], %88 {strides = array<i32>} : memref<48x32xf32, #tpu.memory_space<vmem>>, vector<48x32xf32>,
    } else {
    }
    %c0 = arith.constant 0 : index
    %c0_1 = arith.constant 0 : index
    %3 = vector.load %arg10[%c0, %c0_1] : memref<48x32xbf16, #tpu.memory_space<vmem>>, vector<48x32xbf16>
    %c0_2 = arith.constant 0 : index
    %c0_3 = arith.constant 0 : index
    %4 = vector.load %arg5[%c0_2, %c0_3] : memref<32x64xbf16, #tpu.memory_space<vmem>>, vector<32x64xbf16>
    %cst = arith.constant dense<0.000000e+00> : vector<48x64xf32>
    %5 = tpu.matmul %3, %4, %cst {dimension_numbers = #tpu.dot_dimension_numbers<[1], [0], [0], [1], [0, 0, 1, 1], [], []>} : vector<48x32xbf16>, vector<32x64xbf16>, vector<48x64xf32> -> vector<48x64xf32>
    %c0_4 = arith.constant 0 : index
    %c0_5 = arith.constant 0 : index
    %6 = vector.load %arg6[%c0_4, %c0_5] : memref<1x64xf32, #tpu.memory_space<vmem>>, vector<1x64xf32>
    %7 = vector.broadcast %6 : vector<1x64xf32> to vector<48x64xf32>
    %8 = arith.addf %5, %7 : vector<48x64xf32>
    %cst_6 = arith.constant 5.000000e-01 : f32
    %9 = vector.broadcast %cst_6 : f32 to vector<48x64xf32>
    %10 = arith.mulf %9, %8 : vector<48x64xf32>
    %cst_7 = arith.constant 0.707106769 : f32
    %11 = vector.broadcast %cst_7 : f32 to vector<48x64xf32>
    %12 = arith.mulf %8, %11 : vector<48x64xf32>
    %13 = math.absf %12 : vector<48x64xf32>
    %cst_8 = arith.constant 0.327591091 : f32
    %14 = vector.broadcast %cst_8 : f32 to vector<48x64xf32>
    %15 = arith.mulf %14, %13 : vector<48x64xf32>
    %cst_9 = arith.constant 1.000000e+00 : f32
    %16 = vector.broadcast %cst_9 : f32 to vector<48x64xf32>
    %17 = arith.addf %16, %15 : vector<48x64xf32>
    %cst_10 = arith.constant 1.000000e+00 : f32
    %18 = vector.broadcast %cst_10 : f32 to vector<48x64xf32>
    %19 = arith.divf %18, %17 : vector<48x64xf32>
    %cst_11 = arith.constant 1.06140542 : f32
    %20 = vector.broadcast %cst_11 : f32 to vector<48x64xf32>
    %21 = arith.mulf %20, %19 : vector<48x64xf32>
    %cst_12 = arith.constant 1.45315206 : f32
    %22 = vector.broadcast %cst_12 : f32 to vector<48x64xf32>
    %23 = arith.subf %21, %22 : vector<48x64xf32>
    %24 = arith.mulf %23, %19 : vector<48x64xf32>
    %cst_13 = arith.constant 1.42141378 : f32
    %25 = vector.broadcast %cst_13 : f32 to vector<48x64xf32>
    %26 = arith.addf %24, %25 : vector<48x64xf32>
    %27 = arith.mulf %26, %19 : vector<48x64xf32>
    %cst_14 = arith.constant 0.284496725 : f32
    %28 = vector.broadcast %cst_14 : f32 to vector<48x64xf32>
    %29 = arith.subf %27, %28 : vector<48x64xf32>
    %30 = arith.mulf %29, %19 : vector<48x64xf32>
    %cst_15 = arith.constant 0.254829586 : f32
    %31 = vector.broadcast %cst_15 : f32 to vector<48x64xf32>
    %32 = arith.addf %30, %31 : vector<48x64xf32>
    %33 = arith.mulf %32, %19 : vector<48x64xf32>
    %cst_16 = arith.constant 0.000000e+00 : f32
    %34 = vector.broadcast %cst_16 : f32 to vector<48x64xf32>
    %35 = arith.subf %34, %13 : vector<48x64xf32>
    %36 = arith.mulf %35, %13 : vector<48x64xf32>
    %37 = math.exp %36 : vector<48x64xf32>
    %38 = arith.mulf %33, %37 : vector<48x64xf32>
    %cst_17 = arith.constant 1.000000e+00 : f32
    %39 = vector.broadcast %cst_17 : f32 to vector<48x64xf32>
    %40 = arith.subf %39, %38 : vector<48x64xf32>
    %cst_18 = arith.constant 0.000000e+00 : f32
    %41 = vector.broadcast %cst_18 : f32 to vector<48x64xf32>
    %42 = arith.cmpf oge, %12, %41 : vector<48x64xf32>
    %cst_19 = arith.constant 0.000000e+00 : f32
    %43 = vector.broadcast %cst_19 : f32 to vector<48x64xf32>
    %44 = arith.subf %43, %40 : vector<48x64xf32>
    %45 = arith.select %42, %40, %44 : vector<48x64xi1>, vector<48x64xf32>
    %cst_20 = arith.constant 1.000000e+00 : f32
    %46 = vector.broadcast %cst_20 : f32 to vector<48x64xf32>
    %47 = arith.addf %46, %45 : vector<48x64xf32>
    %48 = arith.mulf %10, %47 : vector<48x64xf32>
    %c0_21 = arith.constant 0 : index
    %c0_22 = arith.constant 0 : index
    %49 = vector.load %arg11[%c0_21, %c0_22] : memref<48x32xf32, #tpu.memory_space<vmem>>, vector<48x32xf32>
    %50 = arith.truncf %48 : vector<48x64xf32> to vector<48x64xbf16>
    %c0_23 = arith.constant 0 : index
    %c0_24 = arith.constant 0 : index
    %51 = vector.load %arg7[%c0_23, %c0_24] : memref<64x32xbf16, #tpu.memory_space<vmem>>, vector<64x32xbf16>
    %cst_25 = arith.constant dense<0.000000e+00> : vector<48x32xf32>
    %52 = tpu.matmul %50, %51, %cst_25 {dimension_numbers = #tpu.dot_dimension_numbers<[1], [0], [0], [1], [0, 0, 1, 1], [], []>} : vector<48x64xbf16>, vector<64x32xbf16>, vector<48x32xf32> -> vector<48x32xf32>
    %53 = arith.addf %49, %52 : vector<48x32xf32>
    %c0_26 = arith.constant 0 : index
    %c0_27 = arith.constant 0 : index
    %54 = vector.load %arg11[%c0_26, %c0_27] : memref<48x32xf32, #tpu.memory_space<vmem>>, vector<48x32xf32>
    tpu.vector_store %arg11[%c0_26, %c0_27], %53 {strides = array<i32>} : memref<48x32xf32, #tpu.memory_space<vmem>>, vector<48x32xf32>,
    %c0_i32_28 = arith.constant 0 : i32
    %55 = arith.cmpi eq, %arg1, %c0_i32_28 : i32
    %56 = arith.extui %55 : i1 to i32
    %c0_i32_29 = arith.constant 0 : i32
    %57 = arith.cmpi ne, %56, %c0_i32_29 : i32
    scf.if %57 {
      %c0_30 = arith.constant 0 : index
      %c0_31 = arith.constant 0 : index
      %58 = vector.load %arg11[%c0_30, %c0_31] : memref<48x32xf32, #tpu.memory_space<vmem>>, vector<48x32xf32>
      %59 = arith.truncf %58 : vector<48x32xf32> to vector<48x32xbf16>
      %c0_32 = arith.constant 0 : index
      %c0_33 = arith.constant 0 : index
      %60 = vector.load %arg9[%c0_32, %c0_33] : memref<48x32xbf16, #tpu.memory_space<vmem>>, vector<48x32xbf16>
      tpu.vector_store %arg9[%c0_32, %c0_33], %59 {strides = array<i32>} : memref<48x32xbf16, #tpu.memory_space<vmem>>, vector<48x32xbf16>,
    } else {
    }
    return
  }
  func.func @transform_0(%arg0: i32, %arg1: i32) -> (i32, i32) {
    %c0_i32 = arith.constant 0 : i32
    %c0_i32_0 = arith.constant 0 : i32
    return %arg0, %c0_i32 : i32, i32
  }
  func.func @transform_1(%arg0: i32, %arg1: i32) -> (i32, i32) {
    %c0_i32 = arith.constant 0 : i32
    %c0_i32_0 = arith.constant 0 : i32
    %c0_i32_1 = arith.constant 0 : i32
    return %c0_i32, %c0_i32_0 : i32, i32
  }
  func.func @transform_2(%arg0: i32, %arg1: i32) -> (i32, i32) {
    %c0_i32 = arith.constant 0 : i32
    %c0_i32_0 = arith.constant 0 : i32
    %c0_i32_1 = arith.constant 0 : i32
    return %c0_i32, %c0_i32_0 : i32, i32
  }
  func.func @transform_3(%arg0: i32, %arg1: i32) -> (i32, i32) {
    %c0_i32 = arith.constant 0 : i32
    %c0_i32_0 = arith.constant 0 : i32
    return %c0_i32, %arg1 : i32, i32
  }
  func.func @transform_4(%arg0: i32, %arg1: i32) -> (i32, i32) {
    %c0_i32 = arith.constant 0 : i32
    %c0_i32_0 = arith.constant 0 : i32
    return %c0_i32, %arg1 : i32, i32
  }
  func.func @transform_5(%arg0: i32, %arg1: i32) -> (i32, i32) {
    %c0_i32 = arith.constant 0 : i32
    %c0_i32_0 = arith.constant 0 : i32
    return %arg1, %c0_i32 : i32, i32
  }
  func.func @transform_6(%arg0: i32, %arg1: i32) -> (i32, i32) {
    %c0_i32 = arith.constant 0 : i32
    %c0_i32_0 = arith.constant 0 : i32
    %c0_i32_1 = arith.constant 0 : i32
    return %c0_i32, %c0_i32_0 : i32, i32
  }
  func.func @transform_7(%arg0: i32, %arg1: i32) -> (i32, i32) {
    %c0_i32 = arith.constant 0 : i32
    %c0_i32_0 = arith.constant 0 : i32
    return %arg0, %c0_i32 : i32, i32
  }
}

module attributes {stable_mosaic.version = 11 : i64} {
  func.func @_head_kernel(%arg0: i32, %arg1: memref<2x32xbf16, #tpu.memory_space<vmem>>, %arg2: memref<1x32xf32, #tpu.memory_space<vmem>>, %arg3: memref<1x32xf32, #tpu.memory_space<vmem>>, %arg4: memref<32x128xbf16, #tpu.memory_space<vmem>>, %arg5: memref<1x128xf32, #tpu.memory_space<vmem>>, %arg6: memref<2x128xf32, #tpu.memory_space<vmem>>) attributes {dimension_semantics = [#tpu.dimension_semantics<parallel>], iteration_bounds = array<i64: 1>, scalar_prefetch = 0 : i64, scratch_operands = 0 : i64, tpu.core_type = #tpu.core_type<tc>, window_params = [{transform_indices = @transform_0, window_bounds = array<i64: 2, 32>}, {pipeline_mode = #tpu.pipeline_mode<synchronous>, transform_indices = @transform_1, window_bounds = array<i64: 1, 32>}, {pipeline_mode = #tpu.pipeline_mode<synchronous>, transform_indices = @transform_2, window_bounds = array<i64: 1, 32>}, {pipeline_mode = #tpu.pipeline_mode<synchronous>, transform_indices = @transform_3, window_bounds = array<i64: 32, 128>}, {pipeline_mode = #tpu.pipeline_mode<synchronous>, transform_indices = @transform_4, window_bounds = array<i64: 1, 128>}, {transform_indices = @transform_5, window_bounds = array<i64: 2, 128>}]} {
    %c0 = arith.constant 0 : index
    %c0_0 = arith.constant 0 : index
    %0 = vector.load %arg1[%c0, %c0_0] : memref<2x32xbf16, #tpu.memory_space<vmem>>, vector<2x32xbf16>
    %c0_1 = arith.constant 0 : index
    %c0_2 = arith.constant 0 : index
    %1 = vector.load %arg2[%c0_1, %c0_2] : memref<1x32xf32, #tpu.memory_space<vmem>>, vector<1x32xf32>
    %c0_3 = arith.constant 0 : index
    %c0_4 = arith.constant 0 : index
    %2 = vector.load %arg3[%c0_3, %c0_4] : memref<1x32xf32, #tpu.memory_space<vmem>>, vector<1x32xf32>
    %3 = arith.extf %0 : vector<2x32xbf16> to vector<2x32xf32>
    %cst = arith.constant dense<0.000000e+00> : vector<2xf32>
    %4 = vector.multi_reduction <add>, %3, %cst [1] : vector<2x32xf32> to vector<2xf32>
    %5 = vector.shape_cast %4 : vector<2xf32> to vector<2x1xf32>
    %cst_5 = arith.constant 3.200000e+01 : f32
    %6 = vector.broadcast %cst_5 : f32 to vector<2x1xf32>
    %7 = arith.divf %5, %6 : vector<2x1xf32>
    %8 = vector.broadcast %7 : vector<2x1xf32> to vector<2x32xf32>
    %9 = arith.subf %3, %8 : vector<2x32xf32>
    %10 = arith.mulf %9, %9 : vector<2x32xf32>
    %cst_6 = arith.constant dense<0.000000e+00> : vector<2xf32>
    %11 = vector.multi_reduction <add>, %10, %cst_6 [1] : vector<2x32xf32> to vector<2xf32>
    %12 = vector.shape_cast %11 : vector<2xf32> to vector<2x1xf32>
    %cst_7 = arith.constant 3.200000e+01 : f32
    %13 = vector.broadcast %cst_7 : f32 to vector<2x1xf32>
    %14 = arith.divf %12, %13 : vector<2x1xf32>
    %15 = vector.broadcast %7 : vector<2x1xf32> to vector<2x32xf32>
    %16 = arith.subf %3, %15 : vector<2x32xf32>
    %cst_8 = arith.constant 9.99999974E-6 : f32
    %17 = vector.broadcast %cst_8 : f32 to vector<2x1xf32>
    %18 = arith.addf %14, %17 : vector<2x1xf32>
    %19 = math.rsqrt %18 : vector<2x1xf32>
    %20 = vector.broadcast %19 : vector<2x1xf32> to vector<2x32xf32>
    %21 = arith.mulf %16, %20 : vector<2x32xf32>
    %22 = vector.broadcast %1 : vector<1x32xf32> to vector<2x32xf32>
    %23 = arith.mulf %21, %22 : vector<2x32xf32>
    %24 = vector.broadcast %2 : vector<1x32xf32> to vector<2x32xf32>
    %25 = arith.addf %23, %24 : vector<2x32xf32>
    %26 = arith.truncf %25 : vector<2x32xf32> to vector<2x32xbf16>
    %c0_9 = arith.constant 0 : index
    %c0_10 = arith.constant 0 : index
    %27 = vector.load %arg4[%c0_9, %c0_10] : memref<32x128xbf16, #tpu.memory_space<vmem>>, vector<32x128xbf16>
    %cst_11 = arith.constant dense<0.000000e+00> : vector<2x128xf32>
    %28 = tpu.matmul %26, %27, %cst_11 {dimension_numbers = #tpu.dot_dimension_numbers<[1], [0], [0], [1], [0, 0, 1, 1], [], []>} : vector<2x32xbf16>, vector<32x128xbf16>, vector<2x128xf32> -> vector<2x128xf32>
    %c0_12 = arith.constant 0 : index
    %c0_13 = arith.constant 0 : index
    %29 = vector.load %arg5[%c0_12, %c0_13] : memref<1x128xf32, #tpu.memory_space<vmem>>, vector<1x128xf32>
    %30 = vector.broadcast %29 : vector<1x128xf32> to vector<2x128xf32>
    %31 = arith.addf %28, %30 : vector<2x128xf32>
    %c0_14 = arith.constant 0 : index
    %c0_15 = arith.constant 0 : index
    %32 = vector.load %arg6[%c0_14, %c0_15] : memref<2x128xf32, #tpu.memory_space<vmem>>, vector<2x128xf32>
    tpu.vector_store %arg6[%c0_14, %c0_15], %31 {strides = array<i32>} : memref<2x128xf32, #tpu.memory_space<vmem>>, vector<2x128xf32>,
    return
  }
  func.func @transform_0(%arg0: i32) -> (i32, i32) {
    %c0_i32 = arith.constant 0 : i32
    %c0_i32_0 = arith.constant 0 : i32
    return %arg0, %c0_i32 : i32, i32
  }
  func.func @transform_1(%arg0: i32) -> (i32, i32) {
    %c0_i32 = arith.constant 0 : i32
    %c0_i32_0 = arith.constant 0 : i32
    %c0_i32_1 = arith.constant 0 : i32
    return %c0_i32, %c0_i32_0 : i32, i32
  }
  func.func @transform_2(%arg0: i32) -> (i32, i32) {
    %c0_i32 = arith.constant 0 : i32
    %c0_i32_0 = arith.constant 0 : i32
    %c0_i32_1 = arith.constant 0 : i32
    return %c0_i32, %c0_i32_0 : i32, i32
  }
  func.func @transform_3(%arg0: i32) -> (i32, i32) {
    %c0_i32 = arith.constant 0 : i32
    %c0_i32_0 = arith.constant 0 : i32
    %c0_i32_1 = arith.constant 0 : i32
    return %c0_i32, %c0_i32_0 : i32, i32
  }
  func.func @transform_4(%arg0: i32) -> (i32, i32) {
    %c0_i32 = arith.constant 0 : i32
    %c0_i32_0 = arith.constant 0 : i32
    %c0_i32_1 = arith.constant 0 : i32
    return %c0_i32, %c0_i32_0 : i32, i32
  }
  func.func @transform_5(%arg0: i32) -> (i32, i32) {
    %c0_i32 = arith.constant 0 : i32
    %c0_i32_0 = arith.constant 0 : i32
    return %arg0, %c0_i32 : i32, i32
  }
}

</mosaic_0001>

<bundles_post_ra>
// kernel: vit_forward.6
= control target key start
LH: loop header
LB: loop body
LE: loop exit
PB: predicated region body
PF: predicated region fallthrough
CT: control target
= control target key end

     0   :  { %8 = vsyncpa [#allocation3], 0  ;;  %s665_s0 = inlined_call_operand.vmem [shape: bf16[2,24,64], index: 0, kind: input, shape index: {}]   ;;  %s666_s1 = inlined_call_operand.vmem [shape: bf16[64,32], index: 1, kind: input, shape index: {}]   ;;  %s667_s2 = inlined_call_operand.vmem [shape: f32[1,24,32], index: 2, kind: input, shape index: {}]   ;;  %s668_s3 = inlined_call_operand.hbm [shape: bf16[2,24,32], index: 3, kind: output, shape index: {}]  }
   0x1   :  { %10 = vsyncpa [#allocation3 + $0x1], 0  ;;  %s541_s12 = smov 0   ;;  %s543_s13 = smov 0  }
   0x2   :  { %s545_s14 = smov 0   ;;  %s547_s15 = smov 0  }
   0x3 LB: > { %s562_s16 = sadd.s32 4294967295, %s516_s15   ;;  %s364_s17 = sadd.s32 4294967294, %s516_s15   ;;  %s516_s15 = sphi %s547_s15, %s674_s15   ;;  %s512_s14 = sphi %s545_s14, %s673_s14   ;;  %s508_s13 = sphi %s543_s13, %s672_s13   ;;  %s504_s12 = sphi %s541_s12, %s671_s12  }
   0x4   : > { %s566_s18 = sadd.s32 1, %s516_s15   ;;  %s91_s19 = sadd.s32 1, %s512_s14 }
   0x5   : > { %s88_s20 = ssub.s32 %s516_s15, %s566_s18  ;;  %p101_p0 = scmp.ne.s32.totalorder %s512_s14, %s508_s13 }
   0x6   : > { %p89_p1 = scmp.eq.s32.totalorder %s88_s20, 0  ;;  %p102_p2 = scmp.eq.s32.totalorder %s562_s16, 1 }
   0x7   : > { %p107_p3 = scmp.ne.s32.totalorder %s508_s13, %s504_s12  ;;  %p108_p4 = scmp.eq.s32.totalorder %s364_s17, 1 }
   0x8   : > { %s577_s21 = scalar_select %p89_p1, %s512_s14, %s91_s19  }
   0x9   : > { %p579_p5 = por %p102_p2, %p101_p0  ;;  %p583_p6 = por %p108_p4, %p107_p3 }
   0xa   : > { %p367_p7 = scmp.ge.s32.totalorder %s516_s15, 1  ;;  %p140_p8 = scmp.lt.s32.totalorder %s516_s15, 3 }
   0xc   : > { %p141_p9 = pnand %p367_p7, %p140_p8 }
   0xd   : > { %v448_v0 = vld [vmem:[%s666_s1] sm:$0xff] (!%p141_p9)   ;;  %p164_p10 = scmp.lt.s32.totalorder (!%p141_p9), %s562_s16, 1  ;;  %v449_v1 = vld [vmem:[%s666_s1 + $0x8] sm:$0xff] (!%p141_p9)   ;;  %v450_v2 = vld [vmem:[%s666_s1 + $0x10] sm:$0xff] (!%p141_p9)   ;;  %vm216_vm0 = vcmask (!%p141_p9), 523264   ;;  %s161_s10 = sand.u32 (!%p141_p9), 1, %s508_s13  }
   0xe   : > { %144 = sbr.rel (%p141_p9) target bundleno = 264 (0x108), region = 32  ;;  %392 = vmatprep.subr.bf16.mxu0 (!%p141_p9), %v448_v0  ;;  %v451_v3 = vld [vmem:[%s666_s1 + $0x18] sm:$0xff] (!%p141_p9)   ;;  %v183_v6 = vld [vmem:[%s667_s2 + $0x10] sm:$0xff] (!%p141_p9)  ;;  %v181_v7 = vld [vmem:[%s667_s2] sm:$0xff] (!%p141_p9)  ;;  %vm284_vm1 = vcmask (!%p141_p9), 257024   ;;  %s624_s5 = scalar_lea.sflag (!%p141_p9), [#allocation3], %s161_s10 }
   0xf   : > { %393 = vmatpush3.bf16.msra.mxu0 (!%p141_p9), %v448_v0  ;;  %s404_s11 = smul.u32 (!%p141_p9), 12, %s161_s10  ;;  %v182_v11 = vld [vmem:[%s667_s2 + $0x8] sm:$0xff] (!%p141_p9) }
  0x10   : > { %394 = vmatprep.subr.bf16.mxu0 (!%p141_p9), %v449_v1  ;;  %s406_s27 = smul.u32 (!%p141_p9), 192, %s562_s16 }
  0x13   : > { %395 = vmatpush3.bf16.msra.mxu0 (!%p141_p9), %v449_v1 }
  0x14   : > { %396 = vmatprep.subr.bf16.mxu0 (!%p141_p9), %v450_v2 }
  0x15   : > { %s165_s28 = scalar_select %p164_p10, %s562_s16, 1 }
  0x16   : > { %s622_s16 = scalar_lea.hbm %s668_s3, %s406_s27 }
  0x17   : > { %s405_s4 = smul.u32 12, %s165_s28  ;;  %397 = vmatpush3.bf16.msra.mxu0 %v450_v2  ;;  %s163_s28 = scalar_lea.vmem [#allocation2], %s404_s11 }
  0x18   : > { %398 = vmatprep.subr.bf16.mxu0 %v451_v3  ;;  %s302_s29 = sshll.u32 %s163_s28, 4  ;;  %s617_s29 = int_to_ptr.vmem [resolvable:$true] %s302_s29 }
  0x19   : > { %s168_s7 = scalar_lea.vmem %s665_s0, %s405_s4  ;;  %s454_s6 = scalar_lea.vmem %s617_s29, 192 }
  0x1a   : > { %v452_v4 = vld [vmem:[%s168_s7] sm:$0xff]   ;;  %v453_v5 = vld [vmem:[%s168_s7 + $0x8] ss:$0 sps:$4 sm:$0xff]   ;;  %p455_p11 = scmp.ne.s32.totalorder %s617_s29, %s454_s6  ;;  %s518_s7 = smov [#allocation2]  }
  0x1b   : > { %400 = vmatprep.mubr.msk.bf16.mxu0 %vm216_vm0, %v452_v4  ;;  %399 = vmatpush3.bf16.msra.mxu0 %v451_v3  ;;  %s458_s8 = sshll.u32 %s518_s7, 4  ;;  %s459_s8 = int_to_ptr.vmem [resolvable:$false] %s458_s8 }
  0x1c   : > { %p456_p12 = pnand %p455_p11, %p579_p5  ;;  %s460_s9 = scalar_lea.vmem %s459_s8, 384 }
  0x1d   : > { %p461_p0 = scmp.lt.s32.totalorder %s617_s29, %s459_s8  ;;  %p462_p1 = scmp.lt.s32.totalorder %s460_s9, %s454_s6 }
  0x1e   : > { %401 = vmatmul.mubr.msk.bf16.vlgmr.msra.gmra.mrb[0].mxu0 %vm216_vm0, %v453_v5  ;;  %p457_p13 = pneg %p456_p12 }
  0x1f   : > { %p463_p2 = por %p462_p1, %p461_p0 }
  0x21   : > { %p464_p3 = pnand %p463_p2, %p457_p13 }
  0xf1   : > { %v402_v8 = vpop.f32.mrb[0].mxu0 }
  0xf2   : > { %v266_v9 = vadd.f32 %v402_v8, %v183_v6  ;;  %v257_v10 = vpop.f32.mrb[1].mxu0 }
  0xf3   : > { %v258_v12 = vadd.f32 %v257_v10, %v181_v7  ;;  %v403_v13 = vpop.f32.mrb[2].mxu0 }
  0xf4   : > { %v385_v14 = vpack.c.bf16 %v266_v9, %v266_v9  ;;  %v260_v15 = vpop.f32.mrb[3].mxu0 }
  0xf5   : > { %v383_v16 = vpack.c.bf16 %v258_v12, %v258_v12  ;;  %v261_v17 = vadd.f32 %v260_v15, %v182_v11 }
  0xf6   : > { %287 = vst.msk [vmem:[%s163_s28 + $0x8] sm:$0xf] %vm284_vm1, %v385_v14 }
  0xf7   : > { %285 = vst.msk [vmem:[%s163_s28] sm:$0xf] %vm284_vm1, %v383_v16  ;;  %v384_v18 = vpack.c.bf16 %v261_v17, %v261_v17 }
  0xf9   : > { %286 = vst.msk [vmem:[%s163_s28 + $0x4] sm:$0xf] %vm284_vm1, %v384_v18 }
  0xfa   : > { %467 = shalt.err (!%p464_p3)
}
  0xfb   : > { %s468_s10 = scalar_lea.hbm %s622_s16, 192  ;;  %s472_s19 = scalar_lea.hbm %s668_s3, 384 }
  0xfc   : > { %p469_p4 = scmp.ne.s32.totalorder %s622_s16, %s468_s10  ;;  %p473_p9 = scmp.lt.u32.totalorder %s622_s16, %s668_s3 }
  0xfd   : > { %p474_p10 = scmp.lt.u32.totalorder %s472_s19, %s468_s10  ;;  %p476_p12 = scmp.lt.u32.totalorder %s468_s10, %s622_s16 }
  0xfe   : > { %p470_p7 = pnand %p469_p4, %p579_p5 }
  0xff   : > { %p475_p11 = por %p474_p10, %p473_p9 }
 0x100   : > { %p471_p8 = pneg %p470_p7 }
 0x101   : > { %p477_p13 = por %p476_p12, %p475_p11 }
 0x103   : > { %p478_p0 = pnand %p477_p13, %p471_p8 }
 0x105   : > { %481 = shalt.err (!%p478_p0)
}
 0x106   : > { %s519_s25 = smov 64   ;;  %s520_s26 = smov 4  }
 0x107   : > { %407 = dma.vmem_to_hbm [thread:$0]  (%p579_p5), %s617_s29, 192, %s622_s16, %s624_s5, %s519_s25, %s519_s25, %s520_s26  }
 0x108 PF: > { %p413_p1 = scmp.ge.s32.totalorder %s516_s15, 2  ;;  %s317_s27 = sand.u32 1, %s504_s12  }
 0x109   : > { %s318_s28 = scalar_lea.sflag [#allocation3], %s317_s27 }
 0x10a   : > { %p410_p2 = pnand %p413_p1, %p583_p6 }
 0x10c   : > { %499 = dma.done.wait (!%p410_p2), %s318_s28, 192  }
 0x10d   : > { %501 = vsyncadd (!%p410_p2), %s318_s28, 4294967104  ;;  %p13_p3 = scmp.ge.s32.totalorder %s566_s18, 4   ;;  %s671_s12 = smov %s508_s13 }
 0x10e   : > { %s672_s13 = smov %s512_s14  ;;  %s673_s14 = smov %s577_s21 }
 0x10f   : > { %s674_s15 = smov %s566_s18  ;;  %15 = sbr.rel (!%p13_p3) target bundleno = 3 (0x3), region = 67 }
 0x116   :  { %323 = vsyncpa [#allocation3], 1 }
 0x117   :  { %325 = vsyncpa [#allocation3 + $0x1], 1 }

// kernel: vit_forward.8
= control target key start
LH: loop header
LB: loop body
LE: loop exit
PB: predicated region body
PF: predicated region fallthrough
CT: control target
= control target key end

     0   :  { %12 = vsyncpa [#allocation5], 0  ;;  %s1362_s0 = inlined_call_operand.hbm [shape: bf16[48,32], index: 0, kind: input, shape index: {}]   ;;  %s1363_s1 = inlined_call_operand.hbm [shape: f32[1,32], index: 1, kind: input, shape index: {}]   ;;  %s1364_s2 = inlined_call_operand.hbm [shape: f32[1,32], index: 2, kind: input, shape index: {}]   ;;  %s1365_s3 = inlined_call_operand.hbm [shape: bf16[32,64], index: 3, kind: input, shape index: {}]   ;;  %s1366_s4 = inlined_call_operand.hbm [shape: f32[1,64], index: 4, kind: input, shape index: {}]   ;;  %s1367_s5 = inlined_call_operand.hbm [shape: bf16[64,32], index: 5, kind: input, shape index: {}]   ;;  %s1368_s6 = inlined_call_operand.hbm [shape: f32[1,32], index: 6, kind: input, shape index: {}]   ;;  %s1369_s7 = inlined_call_operand.hbm [shape: bf16[48,32], index: 7, kind: output, shape index: {}]  }
   0x1   :  { %13 = vsyncpa [#allocation8], 0 }
   0x2   :  { %14 = vsyncpa [#allocation11], 0 }
   0x3   :  { %15 = vsyncpa [#allocation14], 0 }
   0x4   :  { %16 = vsyncpa [#allocation6], 0  ;;  %s1039_s24 = smov [#allocation7]   ;;  %s853_s28 = scalar_lea.hbm %s1363_s1, 16 }
   0x5   :  { %s35_s25 = sshll.u32 %s1039_s24, 4  ;;  %p854_p0 = scmp.ne.s32.totalorder %s1363_s1, %s853_s28  ;;  %s36_s25 = int_to_ptr.vmem [resolvable:$true] %s35_s25 }
   0x6   :  { %p857_p1 = scmp.lt.u32.totalorder %s853_s28, %s1363_s1 }
   0x8   :  { %p859_p2 = pnand %p857_p1, %p854_p0 }
   0xa   :  { %862 = shalt.err (!%p859_p2)
}
   0xb   :  { %s863_s10 = scalar_lea.vmem %s36_s25, 16  ;;  %s867_s11 = scalar_lea.vmem %s36_s25, 32 }
   0xc   :  { %p864_p3 = scmp.ne.s32.totalorder %s36_s25, %s863_s10  ;;  %p868_p4 = scmp.lt.s32.totalorder %s36_s25, %s36_s25 }
   0xd   :  { %p869_p5 = scmp.lt.s32.totalorder %s867_s11, %s863_s10 }
   0xf   :  { %p870_p6 = por %p869_p5, %p868_p4 }
  0x11   :  { %p871_p7 = pnand %p870_p6, %p864_p3 }
  0x13   :  { %874 = shalt.err (!%p871_p7)
}
  0x14   :  { %38 = dma.hbm_to_vmem [thread:$0]  %s1363_s1, 16, %s36_s25, [#allocation8]  }
  0x15   :  { %s1040_s14 = smov [#allocation10]   ;;  %s1041_s16 = smov [#allocation13]  }
  0x16   :  { %s54_s15 = sshll.u32 %s1040_s14, 4  ;;  %s76_s17 = sshll.u32 %s1041_s16, 4  ;;  %s55_s15 = int_to_ptr.vmem [resolvable:$true] %s54_s15  ;;  %s77_s17 = int_to_ptr.vmem [resolvable:$true] %s76_s17 }
  0x17   :  { %s875_s20 = scalar_lea.hbm %s1365_s3, 256 }
  0x18   :  { %p876_p8 = scmp.ne.s32.totalorder %s1365_s3, %s875_s20  ;;  %p879_p9 = scmp.lt.u32.totalorder %s875_s20, %s1365_s3 }
  0x1a   :  { %p881_p10 = pnand %p879_p9, %p876_p8 }
  0x1c   :  { %884 = shalt.err (!%p881_p10)
}
  0x1d   :  { %s885_s1 = scalar_lea.vmem %s55_s15, 256  ;;  %p890_p12 = scmp.lt.s32.totalorder %s55_s15, %s55_s15 }
  0x1e   :  { %p886_p11 = scmp.ne.s32.totalorder %s55_s15, %s885_s1  ;;  %p891_p13 = scmp.lt.s32.totalorder %s885_s1, %s885_s1 }
  0x20   :  { %p892_p0 = por %p891_p13, %p890_p12 }
  0x22   :  { %p893_p1 = pnand %p892_p0, %p886_p11 }
  0x24   :  { %896 = shalt.err (!%p893_p1)
}
  0x25   :  { %s1042_s25 = smov 64   ;;  %s1043_s26 = smov 4  }
  0x26   :  { %60 = dma.hbm_to_vmem [thread:$0]  %s1365_s3, 256, %s55_s15, [#allocation11], %s1042_s25, %s1042_s25, %s1043_s26  }
  0x27   :  { %s897_s8 = scalar_lea.hbm %s1367_s5, 512 }
  0x28   :  { %p898_p2 = scmp.ne.s32.totalorder %s1367_s5, %s897_s8  ;;  %p901_p3 = scmp.lt.u32.totalorder %s897_s8, %s1367_s5 }
  0x2a   :  { %p903_p4 = pnand %p901_p3, %p898_p2 }
  0x2c   :  { %906 = shalt.err (!%p903_p4)
}
  0x2d   :  { %s907_s13 = scalar_lea.vmem %s77_s17, 512  ;;  %p912_p6 = scmp.lt.s32.totalorder %s77_s17, %s77_s17 }
  0x2e   :  { %p908_p5 = scmp.ne.s32.totalorder %s77_s17, %s907_s13  ;;  %p913_p7 = scmp.lt.s32.totalorder %s907_s13, %s907_s13 }
  0x30   :  { %p914_p8 = por %p913_p7, %p912_p6 }
  0x32   :  { %p915_p9 = pnand %p914_p8, %p908_p5 }
  0x34   :  { %918 = shalt.err (!%p915_p9)
}
  0x35   :  { %82 = dma.hbm_to_vmem [thread:$0]  %s1367_s5, 512, %s77_s17, [#allocation14], %s1042_s25, %s1042_s25, %s1043_s26  }
  0x36   :  { %s1044_s15 = smov [#allocation4]   ;;  %s1045_s18 = smov [#allocation9]  }
  0x37   :  { %s22_s16 = sshll.u32 %s1044_s15, 4  ;;  %s45_s19 = sshll.u32 %s1045_s18, 4  ;;  %s23_s16 = int_to_ptr.vmem [resolvable:$true] %s22_s16  ;;  %s46_s19 = int_to_ptr.vmem [resolvable:$true] %s45_s19 }
  0x38   :  { %s919_s22 = scalar_lea.hbm %s1362_s0, 384 }
  0x39   :  { %p920_p10 = scmp.ne.s32.totalorder %s1362_s0, %s919_s22  ;;  %p923_p11 = scmp.lt.u32.totalorder %s919_s22, %s1362_s0 }
  0x3b   :  { %p925_p12 = pnand %p923_p11, %p920_p10 }
  0x3d   :  { %928 = shalt.err (!%p925_p12)
}
  0x3e   :  { %s929_s5 = scalar_lea.vmem %s23_s16, 384  ;;  %p934_p0 = scmp.lt.s32.totalorder %s23_s16, %s23_s16 }
  0x3f   :  { %p930_p13 = scmp.ne.s32.totalorder %s23_s16, %s929_s5  ;;  %p935_p1 = scmp.lt.s32.totalorder %s929_s5, %s929_s5 }
  0x41   :  { %p936_p2 = por %p935_p1, %p934_p0 }
  0x43   :  { %p937_p3 = pnand %p936_p2, %p930_p13 }
  0x45   :  { %940 = shalt.err (!%p937_p3)
}
  0x46   :  { %28 = dma.hbm_to_vmem [thread:$0]  %s1362_s0, 384, %s23_s16, [#allocation5], %s1042_s25, %s1042_s25, %s1043_s26  }
  0x47   :  { %s941_s8 = scalar_lea.hbm %s1364_s2, 16 }
  0x48   :  { %p942_p4 = scmp.ne.s32.totalorder %s1364_s2, %s941_s8  ;;  %p945_p5 = scmp.lt.u32.totalorder %s941_s8, %s1364_s2 }
  0x4a   :  { %p947_p6 = pnand %p945_p5, %p942_p4 }
  0x4c   :  { %950 = shalt.err (!%p947_p6)
}
  0x4d   :  { %s951_s13 = scalar_lea.vmem %s46_s19, 16  ;;  %s955_s3 = scalar_lea.vmem %s46_s19, 32 }
  0x4e   :  { %p952_p7 = scmp.ne.s32.totalorder %s46_s19, %s951_s13  ;;  %p956_p8 = scmp.lt.s32.totalorder %s46_s19, %s46_s19 }
  0x4f   :  { %p957_p9 = scmp.lt.s32.totalorder %s955_s3, %s951_s13 }
  0x51   :  { %p958_p10 = por %p957_p9, %p956_p8 }
  0x53   :  { %p959_p11 = pnand %p958_p10, %p952_p7 }
  0x55   :  { %962 = shalt.err (!%p959_p11)
}
  0x56   :  { %48 = dma.hbm_to_vmem [thread:$0]  %s1364_s2, 16, %s46_s19, [#allocation8]  }
  0x57   :  { %s1046_s15 = smov [#allocation12]   ;;  %s1047_s18 = smov [#allocation15]  }
  0x58   :  { %s67_s16 = sshll.u32 %s1046_s15, 4  ;;  %s89_s20 = sshll.u32 %s1047_s18, 4  ;;  %s68_s16 = int_to_ptr.vmem [resolvable:$true] %s67_s16  ;;  %s90_s20 = int_to_ptr.vmem [resolvable:$true] %s89_s20 }
  0x59   :  { %s963_s23 = scalar_lea.hbm %s1366_s4, 16 }
  0x5a   :  { %p964_p12 = scmp.ne.s32.totalorder %s1366_s4, %s963_s23  ;;  %p967_p13 = scmp.lt.u32.totalorder %s963_s23, %s1366_s4 }
  0x5c   :  { %p969_p0 = pnand %p967_p13, %p964_p12 }
  0x5e   :  { %972 = shalt.err (!%p969_p0)
}
  0x5f   :  { %s973_s2 = scalar_lea.vmem %s68_s16, 16  ;;  %s977_s19 = scalar_lea.vmem %s68_s16, 32 }
  0x60   :  { %p974_p1 = scmp.ne.s32.totalorder %s68_s16, %s973_s2  ;;  %p978_p2 = scmp.lt.s32.totalorder %s68_s16, %s68_s16 }
  0x61   :  { %p979_p3 = scmp.lt.s32.totalorder %s977_s19, %s973_s2 }
  0x63   :  { %p980_p4 = por %p979_p3, %p978_p2 }
  0x65   :  { %p981_p5 = pnand %p980_p4, %p974_p1 }
  0x67   :  { %984 = shalt.err (!%p981_p5)
}
  0x68   :  { %70 = dma.hbm_to_vmem [thread:$0]  %s1366_s4, 16, %s68_s16, [#allocation11]  }
  0x69   :  { %s985_s8 = scalar_lea.hbm %s1368_s6, 16 }
  0x6a   :  { %p986_p6 = scmp.ne.s32.totalorder %s1368_s6, %s985_s8  ;;  %p989_p7 = scmp.lt.u32.totalorder %s985_s8, %s1368_s6 }
  0x6c   :  { %p991_p8 = pnand %p989_p7, %p986_p6 }
  0x6e   :  { %994 = shalt.err (!%p991_p8)
}
  0x6f   :  { %s995_s13 = scalar_lea.vmem %s90_s20, 16  ;;  %s999_s3 = scalar_lea.vmem %s90_s20, 32 }
  0x70   :  { %p996_p9 = scmp.ne.s32.totalorder %s90_s20, %s995_s13  ;;  %p1000_p10 = scmp.lt.s32.totalorder %s90_s20, %s90_s20 }
  0x71   :  { %p1001_p11 = scmp.lt.s32.totalorder %s999_s3, %s995_s13 }
  0x73   :  { %p1002_p12 = por %p1001_p11, %p1000_p10 }
  0x75   :  { %p1003_p13 = pnand %p1002_p12, %p996_p9 }
  0x77   :  { %1006 = shalt.err (!%p1003_p13)
}
  0x78   :  { %92 = dma.hbm_to_vmem [thread:$0]  %s1368_s6, 16, %s90_s20, [#allocation14]  }
  0x79   :  { %1029 = dma.done.wait [#allocation5], 384  }
  0x7a   :  { %1030 = vsyncadd [#allocation5], 4294966912 }
  0x7b   :  { %1031 = dma.done.wait [#allocation8], 32  }
  0x7c   :  { %1032 = vsyncadd [#allocation8], 4294967264 }
  0x7d   :  { %1033 = dma.done.wait [#allocation11], 272  }
  0x7e   :  { %1034 = vsyncadd [#allocation11], 4294967024 }
  0x7f   :  { %1035 = dma.done.wait [#allocation14], 528  }
  0x80   :  { %1036 = vsyncadd [#allocation14], 4294966768  ;;  %v738_v0 = vld [vmem:[#allocation4] sm:$0xff]   ;;  %vm133_vm0 = vcmask 261120   ;;  %v699_v1 = vld [vmem:[#allocation15] ss:$0 sm:$0xff] }
  0x81   :  { %v749_v2 = vld [vmem:[#allocation4 + $0x8] sm:$0xff]   ;;  %v739_v3 = vunpack.c.l.bf16 %v738_v0  ;;  %v740_v5 = vunpack.c.h.bf16 %v738_v0  ;;  %v750_v7 = vld [vmem:[#allocation4 + $0x10] sm:$0xff]   ;;  %v811_v52 = vld [vmem:[#allocation10] sm:$0xff]   ;;  %v1048_v53 = vmov 0.0   ;;  %vm1049_vm1 = vmmov 0   ;;  %s1050_s6 = smov [#allocation16]  }
  0x82   :  { %v743_v4 = vunpack.c.l.bf16 %v749_v2  ;;  %v744_v6 = vunpack.c.h.bf16 %v749_v2  ;;  %v747_v8 = vunpack.c.l.bf16 %v750_v7  ;;  %v748_v9 = vunpack.c.h.bf16 %v750_v7  ;;  %763 = vmatprep.subr.bf16.mxu0 %v1048_v53  ;;  %779 = vmatprep.subr.bf16.mxu1 %v1048_v53  ;;  %v812_v54 = vld [vmem:[#allocation10 + $0x8] sm:$0xff]   ;;  %s682_s14 = sshll.u32 %s1050_s6, 4  ;;  %s683_s14 = int_to_ptr.vmem [resolvable:$true] %s682_s14 }
  0x83   :  { %v134_v10 = vsel %vm133_vm0, %v739_v3, 0.0  ;;  %v250_v11 = vadd.f32 %v739_v3, %v699_v1  ;;  %v251_v14 = vadd.f32 %v740_v5, %v699_v1  ;;  %v137_v16 = vsel %vm133_vm0, %v740_v5, 0.0  ;;  %764 = vmatpush3.bf16.msra.mxu0 %v811_v52  ;;  %767 = vmatprep.mubr.msk.bf16.mxu0 %vm1049_vm1, %v1048_v53  ;;  %s1007_s15 = scalar_lea.vmem %s683_s14, 384  ;;  %p1012_p1 = scmp.lt.s32.totalorder %s683_s14, %s683_s14 }
  0x84   :  { %v140_v12 = vsel %vm133_vm0, %v743_v4, 0.0  ;;  %v252_v13 = vadd.f32 %v743_v4, %v699_v1  ;;  %135 = vadd.xlane.f32.xlu0 %v134_v10  ;;  %v253_v15 = vadd.f32 %v744_v6, %v699_v1  ;;  %v143_v17 = vsel %vm133_vm0, %v744_v6, 0.0  ;;  %765 = vmatprep.subr.bf16.mxu0 %v1048_v53  ;;  %p1008_p0 = scmp.ne.s32.totalorder %s683_s14, %s1007_s15  ;;  %p1013_p2 = scmp.lt.s32.totalorder %s1007_s15, %s1007_s15 }
  0x85   :  { %141 = vadd.xlane.f32.xlu1 %v140_v12  ;;  %256 = vst.msk [vmem:[#allocation3] sm:$0xff] %vm133_vm0, %v250_v11  ;;  %v254_v18 = vadd.f32 %v747_v8, %v699_v1  ;;  %v255_v19 = vadd.f32 %v748_v9, %v699_v1  ;;  %257 = vst.msk [vmem:[#allocation3 + $0x8] sm:$0xff] %vm133_vm0, %v251_v14  ;;  %v146_v20 = vsel %vm133_vm0, %v747_v8, 0.0  ;;  %v149_v21 = vsel %vm133_vm0, %v748_v9, 0.0  ;;  %v697_v11 = vld [vmem:[#allocation7] ss:$0 sm:$0xff] }
  0x86   :  { %258 = vst.msk [vmem:[#allocation3 + $0x10] sm:$0xff] %vm133_vm0, %v252_v13  ;;  %259 = vst.msk [vmem:[#allocation3 + $0x18] sm:$0xff] %vm133_vm0, %v253_v15  ;;  %787 = vmatprep.mubr.msk.bf16.mxu1 %vm1049_vm1, %v1048_v53  ;;  %vm558_vm4 = vcmask 523264   ;;  %vm670_vm9 = vcmask 257024   ;;  %p1014_p3 = por %p1013_p2, %p1012_p1 }
  0x87   :  { %260 = vst.msk [vmem:[#allocation3 + $0x20] sm:$0xff] %vm133_vm0, %v254_v18  ;;  %261 = vst.msk [vmem:[#allocation3 + $0x28] sm:$0xff] %vm133_vm0, %v255_v19  ;;  %766 = vmatpush3.bf16.msra.mxu0 %v812_v54 }
  0x88   :  { %138 = vadd.xlane.f32.xlu0 %v137_v16  ;;  %v698_v16 = vld [vmem:[#allocation9] ss:$0 sm:$0xff]  ;;  %p1015_p4 = pnand %p1014_p3, %p1008_p0 }
  0x89   :  { %144 = vadd.xlane.f32.xlu1 %v143_v17 }
  0x8c   :  { %147 = vadd.xlane.f32.xlu0 %v146_v20 }
  0x8d   :  { %150 = vadd.xlane.f32.xlu1 %v149_v21 }
 0x111   :  { %v136_v22 = vpop.xlane.xlu0 %135 }
 0x112   :  { %v142_v23 = vpop.xlane.xlu1 %141  ;;  %v153_v24 = vmul.f32 0.03125, %v136_v22 }
 0x113   :  { %v155_v25 = vmul.f32 0.03125, %v142_v23 }
 0x114   :  { %v1196_v26 = vsub.f32 %v739_v3, %v153_v24 }
 0x115   :  { %v1198_v27 = vsub.f32 %v743_v4, %v155_v25  ;;  %v139_v28 = vpop.xlane.xlu0 %138 }
 0x116   :  { %v145_v29 = vpop.xlane.xlu1 %144  ;;  %v154_v30 = vmul.f32 0.03125, %v139_v28  ;;  %v165_v32 = vmul.f32 %v1196_v26, %v1196_v26 }
 0x117   :  { %v156_v31 = vmul.f32 0.03125, %v145_v29  ;;  %v167_v33 = vmul.f32 %v1198_v27, %v1198_v27 }
 0x118   :  { %v1204_v34 = vsub.f32 %v740_v5, %v154_v30  ;;  %v171_v36 = vsel %vm133_vm0, %v165_v32, 0.0 }
 0x119   :  { %v1206_v35 = vsub.f32 %v744_v6, %v156_v31  ;;  %172 = vadd.xlane.f32.xlu0 %v171_v36  ;;  %v148_v37 = vpop.xlane.xlu0 %147  ;;  %v177_v39 = vsel %vm133_vm0, %v167_v33, 0.0 }
 0x11a   :  { %v151_v38 = vpop.xlane.xlu1 %150  ;;  %v157_v40 = vmul.f32 0.03125, %v148_v37  ;;  %v166_v42 = vmul.f32 %v1204_v34, %v1204_v34 }
 0x11b   :  { %v158_v41 = vmul.f32 0.03125, %v151_v38  ;;  %v168_v43 = vmul.f32 %v1206_v35, %v1206_v35 }
 0x11c   :  { %v1214_v44 = vsub.f32 %v747_v8, %v157_v40  ;;  %v174_v46 = vsel %vm133_vm0, %v166_v42, 0.0  ;;  %v814_v42 = vld [vmem:[#allocation13 + $0x8] sm:$0xff]  }
 0x11d   :  { %v1216_v45 = vsub.f32 %v748_v9, %v158_v41  ;;  %178 = vadd.xlane.f32.xlu0 %v177_v39  ;;  %175 = vadd.xlane.f32.xlu1 %v174_v46  ;;  %v180_v47 = vsel %vm133_vm0, %v168_v43, 0.0  ;;  %v813_v41 = vld [vmem:[#allocation13] sm:$0xff]   ;;  %v815_v43 = vld [vmem:[#allocation13 + $0x10] sm:$0xff]  }
 0x11e   :  { %v169_v48 = vmul.f32 %v1214_v44, %v1214_v44  ;;  %780 = vmatpush3.bf16.msra.mxu1 %v813_v41 }
 0x11f   :  { %v170_v49 = vmul.f32 %v1216_v45, %v1216_v45  ;;  %781 = vmatprep.subr.bf16.mxu1 %v1048_v53 }
 0x120   :  { %v183_v50 = vsel %vm133_vm0, %v169_v48, 0.0 }
 0x121   :  { %181 = vadd.xlane.f32.xlu1 %v180_v47  ;;  %184 = vadd.xlane.f32.xlu0 %v183_v50  ;;  %v186_v51 = vsel %vm133_vm0, %v170_v49, 0.0 }
 0x122   :  { %782 = vmatpush3.bf16.msra.mxu1 %v814_v42 }
 0x123   :  { %783 = vmatprep.subr.bf16.mxu1 %v1048_v53 }
 0x125   :  { %187 = vadd.xlane.f32.xlu1 %v186_v51 }
 0x126   :  { %784 = vmatpush3.bf16.msra.mxu1 %v815_v43 }
 0x127   :  { %785 = vmatprep.subr.bf16.mxu1 %v1048_v53 }
 0x1a6   :  { %v173_v55 = vpop.xlane.xlu0 %172 }
 0x1a7   :  { %v189_v56 = vmul.f32 0.03125, %v173_v55 }
 0x1a9   :  { %v195_v57 = vadd.f32 1e-05, %v189_v56 }
 0x1aa   :  { %v176_v58 = vpop.xlane.xlu1 %175  ;;  %v179_v59 = vpop.xlane.xlu0 %178 }
 0x1ab   :  { %817 = vrsqrt.f32 %v195_v57  ;;  %v190_v60 = vmul.f32 0.03125, %v176_v58  ;;  %v191_v61 = vmul.f32 0.03125, %v179_v59 }
 0x1ad   :  { %v196_v62 = vadd.f32 1e-05, %v190_v60  ;;  %v197_v63 = vadd.f32 1e-05, %v191_v61 }
 0x1ae   :  { %v182_v0 = vpop.xlane.xlu1 %181  ;;  %v185_v1 = vpop.xlane.xlu0 %184 }
 0x1af   :  { %819 = vrsqrt.f32 %v196_v62  ;;  %v192_v2 = vmul.f32 0.03125, %v182_v0  ;;  %v193_v3 = vmul.f32 0.03125, %v185_v1 }
 0x1b0   :  { %821 = vrsqrt.f32 %v197_v63 }
 0x1b1   :  { %v198_v4 = vadd.f32 1e-05, %v192_v2  ;;  %v199_v5 = vadd.f32 1e-05, %v193_v3 }
 0x1b2   :  { %v188_v6 = vpop.xlane.xlu1 %187 }
 0x1b3   :  { %823 = vrsqrt.f32 %v198_v4  ;;  %v194_v7 = vmul.f32 0.03125, %v188_v6 }
 0x1b4   :  { %825 = vrsqrt.f32 %v199_v5 }
 0x1b5   :  { %v818_v8 = vpop.eup %817  ;;  %v200_v9 = vadd.f32 1e-05, %v194_v7 }
 0x1b6   :  { %v207_v10 = vmul.f32 %v818_v8, %v1196_v26 }
 0x1b7   :  { %827 = vrsqrt.f32 %v200_v9 }
 0x1b8   :  { %v219_v14 = vmul.f32 %v697_v11, %v207_v10 }
 0x1b9   :  { %v820_v12 = vpop.eup %819 }
 0x1ba   :  { %v822_v13 = vpop.eup %821  ;;  %v208_v15 = vmul.f32 %v820_v12, %v1204_v34  ;;  %v231_v21 = vadd.f32 %v698_v16, %v219_v14 }
 0x1bb   :  { %v209_v17 = vmul.f32 %v822_v13, %v1198_v27 }
 0x1bc   :  { %v220_v18 = vmul.f32 %v697_v11, %v208_v15 }
 0x1bd   :  { %v824_v19 = vpop.eup %823  ;;  %v221_v23 = vmul.f32 %v697_v11, %v209_v17 }
 0x1be   :  { %v826_v20 = vpop.eup %825  ;;  %v232_v22 = vadd.f32 %v698_v16, %v220_v18  ;;  %v210_v24 = vmul.f32 %v824_v19, %v1206_v35 }
 0x1bf   :  { %v211_v25 = vmul.f32 %v826_v20, %v1214_v44  ;;  %v233_v30 = vadd.f32 %v698_v16, %v221_v23  ;;  %v816_v44 = vld [vmem:[#allocation13 + $0x18] sm:$0xff]  }
 0x1c0   :  { %v237_v26 = vpack.c.bf16 %v232_v22, %v231_v21  ;;  %v222_v28 = vmul.f32 %v697_v11, %v210_v24  ;;  %786 = vmatpush3.bf16.msra.mxu1 %v816_v44 }
 0x1c1   :  { %v828_v29 = vpop.eup %827  ;;  %v223_v32 = vmul.f32 %v697_v11, %v211_v25 }
 0x1c2   :  { %240 = vst.msk [vmem:[#allocation2] sm:$0xff] %vm133_vm0, %v237_v26  ;;  %v234_v31 = vadd.f32 %v698_v16, %v222_v28  ;;  %v212_v27 = vmul.f32 %v828_v29, %v1216_v45  ;;  %v700_v45 = vld [vmem:[#allocation12] ss:$0 sm:$0xff] }
 0x1c3   :  { %v235_v36 = vadd.f32 %v698_v16, %v223_v32 }
 0x1c4   :  { %v238_v33 = vpack.c.bf16 %v234_v31, %v233_v30  ;;  %v224_v34 = vmul.f32 %v697_v11, %v212_v27 }
 0x1c6   :  { %241 = vst.msk [vmem:[#allocation2 + $0x8] sm:$0xff] %vm133_vm0, %v238_v33  ;;  %v236_v37 = vadd.f32 %v698_v16, %v224_v34 }
 0x1c8   :  { %v239_v38 = vpack.c.bf16 %v236_v37, %v235_v36 }
 0x1c9   :  { %v262_v35 = vld [vmem:[#allocation2] sm:$0xff] }
 0x1ca   :  { %242 = vst.msk [vmem:[#allocation2 + $0x10] sm:$0xff] %vm133_vm0, %v239_v38  ;;  %768 = vmatmul.mubr.msk.bf16.vlgmr.msra.gmra.mrb[0].mxu0 %vm133_vm0, %v262_v35 }
 0x1cb   :  { %771 = vmatprep.mubr.msk.bf16.mxu0 %vm1049_vm1, %v1048_v53 }
 0x1cd   :  { %v263_v39 = vld [vmem:[#allocation2 + $0x8] sm:$0xff] }
 0x1d1   :  { %v264_v40 = vld [vmem:[#allocation2 + $0x10] sm:$0xff] }
 0x1d2   :  { %772 = vmatmul.mubr.msk.bf16.gmra.mrb[4].mxu0 %vm133_vm0, %v263_v39 }
 0x1d3   :  { %775 = vmatprep.mubr.msk.bf16.mxu0 %vm1049_vm1, %v1048_v53 }
 0x1da   :  { %776 = vmatmul.mubr.msk.bf16.gmra.mrb[8].mxu0 %vm133_vm0, %v264_v40 }
 0x29d   :  { %v332_v46 = vpop.f32.mrb[0].mxu0 }
 0x29e   :  { %v1252_v47 = vadd.f32 %v700_v45, %v332_v46  ;;  %v769_v48 = vpop.f32.mrb[1].mxu0 }
 0x29f   :  { %v335_v49 = vpop.f32.mrb[2].mxu0 }
 0x2a0   :  { %v1255_v50 = vmul.f32 0.70710677, %v1252_v47  ;;  %v1257_v51 = vadd.f32 %v700_v45, %v335_v49  ;;  %v770_v52 = vpop.f32.mrb[3].mxu0 }
 0x2a2   :  { %v367_v54 = vand.u32 2147483647, %v1255_v50  ;;  %v1261_v55 = vmul.f32 0.70710677, %v1257_v51  ;;  %vm487_vm2 = vcmp.ge.f32.partialorder %v1255_v50, 0.0 }
 0x2a4   :  { %v373_v56 = vmul.f32 0.3275911, %v367_v54  ;;  %v368_v57 = vand.u32 2147483647, %v1261_v55  ;;  %v451_v8 = vsub.f32 0.0, %v367_v54  ;;  %vm488_vm3 = vcmp.ge.f32.partialorder %v1261_v55, 0.0 }
 0x2a5   :  { %v340_v58 = vpop.f32.mrb[4].mxu0 }
 0x2a6   :  { %v379_v59 = vadd.f32 1.0, %v373_v56  ;;  %v374_v60 = vmul.f32 0.3275911, %v368_v57  ;;  %v773_v61 = vpop.f32.mrb[5].mxu0  ;;  %v1264_v62 = vadd.f32 %v700_v45, %v340_v58  ;;  %v452_v16 = vsub.f32 0.0, %v368_v57 }
 0x2a7   :  { %v343_v63 = vpop.f32.mrb[6].mxu0  ;;  %v457_v20 = vmul.f32 %v451_v8, %v367_v54 }
 0x2a8   :  { %829 = vrcp.f32 %v379_v59  ;;  %v380_v0 = vadd.f32 1.0, %v374_v60  ;;  %v774_v1 = vpop.f32.mrb[7].mxu0  ;;  %v1267_v2 = vmul.f32 0.70710677, %v1264_v62  ;;  %v1269_v3 = vadd.f32 %v700_v45, %v343_v63 }
 0x2a9   :  { %v458_v29 = vmul.f32 %v452_v16, %v368_v57  ;;  %v463_v31 = vmul.f32 1.442695, %v457_v20 }
 0x2aa   :  { %831 = vrcp.f32 %v380_v0  ;;  %v369_v4 = vand.u32 2147483647, %v1267_v2  ;;  %v1273_v5 = vmul.f32 0.70710677, %v1269_v3  ;;  %vm489_vm5 = vcmp.ge.f32.partialorder %v1267_v2, 0.0 }
 0x2ab   :  { %v465_v35 = vmul.f32 1.442695, %v458_v29 }
 0x2ac   :  { %v375_v6 = vmul.f32 0.3275911, %v369_v4  ;;  %v370_v9 = vand.u32 2147483647, %v1273_v5  ;;  %v453_v34 = vsub.f32 0.0, %v369_v4  ;;  %vm490_vm6 = vcmp.ge.f32.partialorder %v1273_v5, 0.0 }
 0x2ad   :  { %v348_v7 = vpop.f32.mrb[8].mxu0 }
 0x2ae   :  { %v1276_v10 = vadd.f32 %v700_v45, %v348_v7  ;;  %v777_v11 = vpop.f32.mrb[9].mxu0  ;;  %v381_v12 = vadd.f32 1.0, %v375_v6  ;;  %v376_v14 = vmul.f32 0.3275911, %v370_v9  ;;  %v454_v39 = vsub.f32 0.0, %v370_v9 }
 0x2af   :  { %v351_v13 = vpop.f32.mrb[10].mxu0  ;;  %v459_v44 = vmul.f32 %v453_v34, %v369_v4 }
 0x2b0   :  { %v1279_v15 = vmul.f32 0.70710677, %v1276_v10  ;;  %833 = vrcp.f32 %v381_v12  ;;  %v1281_v17 = vadd.f32 %v700_v45, %v351_v13  ;;  %v778_v18 = vpop.f32.mrb[11].mxu0  ;;  %v382_v21 = vadd.f32 1.0, %v376_v14 }
 0x2b1   :  { %v460_v49 = vmul.f32 %v454_v39, %v370_v9  ;;  %v467_v59 = vmul.f32 1.442695, %v459_v44 }
 0x2b2   :  { %v830_v19 = vpop.eup %829  ;;  %v371_v22 = vand.u32 2147483647, %v1279_v15  ;;  %v1285_v24 = vmul.f32 0.70710677, %v1281_v17  ;;  %835 = vrcp.f32 %v382_v21  ;;  %vm491_vm7 = vcmp.ge.f32.partialorder %v1279_v15, 0.0 }
 0x2b3   :  { %v397_v23 = vmul.f32 1.0614054, %v830_v19  ;;  %v469_v6 = vmul.f32 1.442695, %v460_v49 }
 0x2b4   :  { %v377_v25 = vmul.f32 0.3275911, %v371_v22  ;;  %v832_v26 = vpop.eup %831  ;;  %v372_v30 = vand.u32 2147483647, %v1285_v24  ;;  %v455_v57 = vsub.f32 0.0, %v371_v22  ;;  %vm492_vm8 = vcmp.ge.f32.partialorder %v1285_v24, 0.0 }
 0x2b5   :  { %v706_v28 = vadd.f32 -1.4531521, %v397_v23  ;;  %v398_v32 = vmul.f32 1.0614054, %v832_v26 }
 0x2b6   :  { %v383_v27 = vadd.f32 1.0, %v377_v25  ;;  %v378_v36 = vmul.f32 0.3275911, %v372_v30  ;;  %v456_v0 = vsub.f32 0.0, %v372_v30  ;;  %v461_v11 = vmul.f32 %v455_v57, %v371_v22 }
 0x2b7   :  { %v409_v33 = vmul.f32 %v830_v19, %v706_v28  ;;  %v707_v37 = vadd.f32 -1.4531521, %v398_v32 }
 0x2b8   :  { %837 = vrcp.f32 %v383_v27  ;;  %v384_v40 = vadd.f32 1.0, %v378_v36  ;;  %v462_v21 = vmul.f32 %v456_v0, %v372_v30  ;;  %v471_v22 = vmul.f32 1.442695, %v461_v11 }
 0x2b9   :  { %v415_v38 = vadd.f32 1.4214138, %v409_v33  ;;  %839 = vpow2.f32 %v463_v31  ;;  %v410_v41 = vmul.f32 %v832_v26, %v707_v37 }
 0x2ba   :  { %v1288_v42 = vpop.eup %833  ;;  %841 = vrcp.f32 %v384_v40 }
 0x2bb   :  { %v421_v43 = vmul.f32 %v830_v19, %v415_v38  ;;  %v416_v45 = vadd.f32 1.4214138, %v410_v41  ;;  %v399_v46 = vmul.f32 1.0614054, %v1288_v42  ;;  %843 = vpow2.f32 %v465_v35 }
 0x2bc   :  { %v1291_v52 = vpop.eup %835  ;;  %845 = vpow2.f32 %v467_v59  ;;  %v473_v35 = vmul.f32 1.442695, %v462_v21 }
 0x2bd   :  { %v712_v48 = vadd.f32 -0.28449672, %v421_v43  ;;  %v422_v54 = vmul.f32 %v832_v26, %v416_v45  ;;  %v708_v56 = vadd.f32 -1.4531521, %v399_v46  ;;  %v400_v60 = vmul.f32 1.0614054, %v1291_v52 }
 0x2be   :  { %847 = vpow2.f32 %v469_v6 }
 0x2bf   :  { %v433_v58 = vmul.f32 %v830_v19, %v712_v48  ;;  %v713_v61 = vadd.f32 -0.28449672, %v422_v54  ;;  %v411_v63 = vmul.f32 %v1288_v42, %v708_v56  ;;  %v709_v4 = vadd.f32 -1.4531521, %v400_v60 }
 0x2c0   :  { %849 = vpow2.f32 %v471_v22  ;;  %v355_v60 = vmul.f32 0.5, %v1252_v47 }
 0x2c1   :  { %v439_v1 = vadd.f32 0.2548296, %v433_v58  ;;  %v434_v8 = vmul.f32 %v832_v26, %v713_v61  ;;  %v417_v9 = vadd.f32 1.4214138, %v411_v63  ;;  %v412_v13 = vmul.f32 %v1291_v52, %v709_v4 }
 0x2c2   :  { %v1295_v7 = vpop.eup %837  ;;  %851 = vpow2.f32 %v473_v35  ;;  %v356_v4 = vmul.f32 0.5, %v1257_v51 }
 0x2c3   :  { %v445_v12 = vmul.f32 %v830_v19, %v439_v1  ;;  %v401_v14 = vmul.f32 1.0614054, %v1295_v7  ;;  %v840_v16 = vpop.eup %839  ;;  %v440_v18 = vadd.f32 0.2548296, %v434_v8  ;;  %v423_v20 = vmul.f32 %v1288_v42, %v417_v9 }
 0x2c4   :  { %v1300_v23 = vpop.eup %841  ;;  %v418_v28 = vadd.f32 1.4214138, %v412_v13 }
 0x2c5   :  { %v475_v25 = vmul.f32 %v840_v16, %v445_v12  ;;  %v710_v29 = vadd.f32 -1.4531521, %v401_v14  ;;  %v446_v31 = vmul.f32 %v832_v26, %v440_v18  ;;  %v714_v32 = vadd.f32 -0.28449672, %v423_v20  ;;  %v844_v27 = vpop.eup %843 }
 0x2c6   :  { %v402_v19 = vmul.f32 1.0614054, %v1300_v23  ;;  %v424_v34 = vmul.f32 %v1291_v52, %v418_v28  ;;  %v846_v50 = vpop.eup %845 }
 0x2c7   :  { %v481_v33 = vsub.f32 1.0, %v475_v25  ;;  %v413_v36 = vmul.f32 %v1295_v7, %v710_v29  ;;  %v476_v37 = vmul.f32 %v844_v27, %v446_v31  ;;  %v435_v30 = vmul.f32 %v1288_v42, %v714_v32 }
 0x2c8   :  { %v711_v38 = vadd.f32 -1.4531521, %v402_v19  ;;  %v715_v40 = vadd.f32 -0.28449672, %v424_v34  ;;  %v848_v1 = vpop.eup %847  ;;  %v358_v27 = vmul.f32 0.5, %v1269_v3  ;;  %v360_v3 = vmul.f32 0.5, %v1281_v17 }
 0x2c9   :  { %v493_v39 = vsub.f32 0.0, %v481_v33  ;;  %v419_v26 = vadd.f32 1.4214138, %v413_v36  ;;  %v482_v41 = vsub.f32 1.0, %v476_v37  ;;  %v441_v43 = vadd.f32 0.2548296, %v435_v30 }
 0x2ca   :  { %v414_v44 = vmul.f32 %v1300_v23, %v711_v38  ;;  %v436_v46 = vmul.f32 %v1291_v52, %v715_v40  ;;  %v850_v21 = vpop.eup %849  ;;  %v519_v17 = vld [vmem:[#allocation3 + $0x10] sm:$0xff] }
 0x2cb   :  { %v499_v45 = vsel %vm487_vm2, %v481_v33, %v493_v39  ;;  %v425_v48 = vmul.f32 %v1295_v7, %v419_v26  ;;  %v494_v49 = vsub.f32 0.0, %v482_v41  ;;  %v447_v54 = vmul.f32 %v1288_v42, %v441_v43 }
 0x2cc   :  { %v420_v56 = vadd.f32 1.4214138, %v414_v44  ;;  %v505_v57 = vadd.f32 1.0, %v499_v45  ;;  %v442_v58 = vadd.f32 0.2548296, %v436_v46  ;;  %v852_v22 = vpop.eup %851  ;;  %v517_v44 = vld [vmem:[#allocation3] sm:$0xff] }
 0x2cd   :  { %v716_v59 = vadd.f32 -0.28449672, %v425_v48  ;;  %v500_v61 = vsel %vm488_vm3, %v482_v41, %v494_v49  ;;  %v477_v63 = vmul.f32 %v846_v50, %v447_v54  ;;  %v518_v46 = vld [vmem:[#allocation3 + $0x8] sm:$0xff] }
 0x2ce   :  { %v426_v0 = vmul.f32 %v1300_v23, %v420_v56  ;;  %v506_v6 = vadd.f32 1.0, %v500_v61  ;;  %v448_v55 = vmul.f32 %v1291_v52, %v442_v58  ;;  %v511_v11 = vmul.f32 %v505_v57, %v355_v60 }
 0x2cf   :  { %v437_v42 = vmul.f32 %v1295_v7, %v716_v59  ;;  %v483_v8 = vsub.f32 1.0, %v477_v63 }
 0x2d0   :  { %v717_v9 = vadd.f32 -0.28449672, %v426_v0  ;;  %v512_v12 = vmul.f32 %v506_v6, %v356_v4  ;;  %v478_v13 = vmul.f32 %v848_v1, %v448_v55  ;;  %v521_v4 = vld [vmem:[#allocation3 + $0x20] sm:$0xff]  ;;  %v522_v55 = vld [vmem:[#allocation3 + $0x28] sm:$0xff] }
 0x2d1   :  { %v443_v14 = vadd.f32 0.2548296, %v437_v42  ;;  %v495_v16 = vsub.f32 0.0, %v483_v8 }
 0x2d2   :  { %v438_v47 = vmul.f32 %v1300_v23, %v717_v9  ;;  %v523_v18 = vpack.c.bf16 %v512_v12, %v511_v11  ;;  %v484_v20 = vsub.f32 1.0, %v478_v13 }
 0x2d3   :  { %v449_v51 = vmul.f32 %v1295_v7, %v443_v14  ;;  %v501_v52 = vsel %vm489_vm5, %v483_v8, %v495_v16  ;;  %v357_v7 = vmul.f32 0.5, %v1264_v62  ;;  %v359_v62 = vmul.f32 0.5, %v1276_v10 }
 0x2d4   :  { %v444_v25 = vadd.f32 0.2548296, %v438_v47  ;;  %v496_v28 = vsub.f32 0.0, %v484_v20  ;;  %788 = vmatmul.mubr.msk.bf16.vlgmr.msra.gmra.mrb[0].mxu1 %vm558_vm4, %v523_v18  ;;  %v507_v31 = vadd.f32 1.0, %v501_v52 }
 0x2d5   :  { %v479_v29 = vmul.f32 %v850_v21, %v449_v51  ;;  %791 = vmatprep.mubr.msk.bf16.mxu1 %vm1049_vm1, %v1048_v53 }
 0x2d6   :  { %v450_v32 = vmul.f32 %v1300_v23, %v444_v25  ;;  %v502_v2 = vsel %vm490_vm6, %v484_v20, %v496_v28  ;;  %v513_v37 = vmul.f32 %v507_v31, %v357_v7 }
 0x2d7   :  { %v485_v19 = vsub.f32 1.0, %v479_v29  ;;  %v508_v33 = vadd.f32 1.0, %v502_v2 }
 0x2d8   :  { %v480_v34 = vmul.f32 %v852_v22, %v450_v32 }
 0x2d9   :  { %v497_v36 = vsub.f32 0.0, %v485_v19  ;;  %v514_v30 = vmul.f32 %v508_v33, %v358_v27 }
 0x2da   :  { %v486_v5 = vsub.f32 1.0, %v480_v34 }
 0x2db   :  { %v503_v38 = vsel %vm491_vm7, %v485_v19, %v497_v36  ;;  %v524_v23 = vpack.c.bf16 %v514_v30, %v513_v37 }
 0x2dc   :  { %v498_v35 = vsub.f32 0.0, %v486_v5  ;;  %v509_v39 = vadd.f32 1.0, %v503_v38 }
 0x2dd   :  { %792 = vmatmul.mubr.msk.bf16.gmra.mrb[4].mxu1 %vm558_vm4, %v524_v23 }
 0x2de   :  { %v504_v40 = vsel %vm492_vm8, %v486_v5, %v498_v35  ;;  %795 = vmatprep.mubr.msk.bf16.mxu1 %vm1049_vm1, %v1048_v53  ;;  %v515_v41 = vmul.f32 %v509_v39, %v359_v62  ;;  %v520_v53 = vld [vmem:[#allocation3 + $0x18] sm:$0xff] }
 0x2df   :  { %v510_v26 = vadd.f32 1.0, %v504_v40 }
 0x2e1   :  { %v516_v15 = vmul.f32 %v510_v26, %v360_v3 }
 0x2e3   :  { %v525_v43 = vpack.c.bf16 %v516_v15, %v515_v41 }
 0x2e5   :  { %796 = vmatmul.mubr.msk.bf16.gmra.mrb[8].mxu1 %vm558_vm4, %v525_v43 }
 0x3a7   :  { %v602_v45 = vpop.f32.mrb[0].mxu1 }
 0x3a8   :  { %v625_v24 = vadd.f32 %v602_v45, %v517_v44  ;;  %v789_v48 = vpop.f32.mrb[1].mxu1 }
 0x3a9   :  { %v605_v49 = vpop.f32.mrb[2].mxu1 }
 0x3aa   :  { %631 = vst.msk [vmem:[#allocation3] sm:$0xff] %vm133_vm0, %v625_v24  ;;  %v626_v10 = vadd.f32 %v605_v49, %v518_v46  ;;  %v790_v54 = vpop.f32.mrb[3].mxu1 }
 0x3ac   :  { %632 = vst.msk [vmem:[#allocation3 + $0x8] sm:$0xff] %vm133_vm0, %v626_v10 }
 0x3b0   :  { %v610_v56 = vpop.f32.mrb[4].mxu1 }
 0x3b1   :  { %v627_v50 = vadd.f32 %v610_v56, %v519_v17  ;;  %v793_v57 = vpop.f32.mrb[5].mxu1  ;;  %v640_v58 = vld [vmem:[#allocation3] sm:$0xff] }
 0x3b2   :  { %v613_v59 = vpop.f32.mrb[6].mxu1  ;;  %v731_v60 = vpack.c.bf16 %v640_v58, %v640_v58 }
 0x3b3   :  { %633 = vst.msk [vmem:[#allocation3 + $0x10] sm:$0xff] %vm133_vm0, %v627_v50  ;;  %v628_v61 = vadd.f32 %v613_v59, %v520_v53  ;;  %v794_v63 = vpop.f32.mrb[7].mxu1  ;;  %v641_v0 = vld [vmem:[#allocation3 + $0x8] sm:$0xff] }
 0x3b4   :  { %v732_v1 = vpack.c.bf16 %v641_v0, %v641_v0  ;;  %671 = vst.msk [vmem:[#allocation16] sm:$0xf] %vm670_vm9, %v731_v60 }
 0x3b5   :  { %634 = vst.msk [vmem:[#allocation3 + $0x18] sm:$0xff] %vm133_vm0, %v628_v61 }
 0x3b6   :  { %672 = vst.msk [vmem:[#allocation16 + $0x4] sm:$0xf] %vm670_vm9, %v732_v1 }
 0x3b8   :  { %v618_v6 = vpop.f32.mrb[8].mxu1 }
 0x3b9   :  { %v629_v42 = vadd.f32 %v618_v6, %v521_v4  ;;  %v797_v8 = vpop.f32.mrb[9].mxu1 }
 0x3ba   :  { %v621_v9 = vpop.f32.mrb[10].mxu1  ;;  %v642_v11 = vld [vmem:[#allocation3 + $0x10] sm:$0xff] }
 0x3bb   :  { %635 = vst.msk [vmem:[#allocation3 + $0x20] sm:$0xff] %vm133_vm0, %v629_v42  ;;  %v630_v12 = vadd.f32 %v621_v9, %v522_v55  ;;  %v798_v13 = vpop.f32.mrb[11].mxu1  ;;  %v733_v14 = vpack.c.bf16 %v642_v11, %v642_v11 }
 0x3bc   :  { %v643_v16 = vld [vmem:[#allocation3 + $0x18] sm:$0xff] }
 0x3bd   :  { %636 = vst.msk [vmem:[#allocation3 + $0x28] sm:$0xff] %vm133_vm0, %v630_v12  ;;  %v734_v47 = vpack.c.bf16 %v643_v16, %v643_v16 }
 0x3be   :  { %673 = vst.msk [vmem:[#allocation16 + $0x8] sm:$0xf] %vm670_vm9, %v733_v14 }
 0x3bf   :  { %674 = vst.msk [vmem:[#allocation16 + $0xc] sm:$0xf] %vm670_vm9, %v734_v47 }
 0x3c2   :  { %v644_v18 = vld [vmem:[#allocation3 + $0x20] sm:$0xff] }
 0x3c3   :  { %v735_v20 = vpack.c.bf16 %v644_v18, %v644_v18 }
 0x3c4   :  { %v645_v51 = vld [vmem:[#allocation3 + $0x28] sm:$0xff] }
 0x3c5   :  { %v736_v21 = vpack.c.bf16 %v645_v51, %v645_v51  ;;  %675 = vst.msk [vmem:[#allocation16 + $0x10] sm:$0xf] %vm670_vm9, %v735_v20 }
 0x3c7   :  { %676 = vst.msk [vmem:[#allocation16 + $0x14] sm:$0xf] %vm670_vm9, %v736_v21 }
 0x3c8   :  { %1018 = shalt.err (!%p1015_p4)
}
 0x3c9   :  { %s1019_s20 = scalar_lea.hbm %s1369_s7, 384 }
 0x3ca   :  { %p1020_p5 = scmp.ne.s32.totalorder %s1369_s7, %s1019_s20  ;;  %p1023_p6 = scmp.lt.u32.totalorder %s1019_s20, %s1369_s7 }
 0x3cc   :  { %p1025_p7 = pnand %p1023_p6, %p1020_p5 }
 0x3ce   :  { %1028 = shalt.err (!%p1025_p7)
}
 0x3cf   :  { %688 = dma.vmem_to_hbm [thread:$0]  %s683_s14, 384, %s1369_s7, [#allocation6], %s1042_s25, %s1042_s25, %s1043_s26  }
 0x3d0   :  { %1037 = dma.done.wait [#allocation6], 384  }
 0x3d1   :  { %1038 = vsyncadd [#allocation6], 4294966912 }
 0x3d2   :  { %692 = vsyncpa [#allocation5], 1 }
 0x3d3   :  { %693 = vsyncpa [#allocation8], 1 }
 0x3d4   :  { %694 = vsyncpa [#allocation11], 1 }
 0x3d5   :  { %695 = vsyncpa [#allocation14], 1 }
 0x3d6   :  { %696 = vsyncpa [#allocation6], 1 }

// kernel: vit_forward.7
= control target key start
LH: loop header
LB: loop body
LE: loop exit
PB: predicated region body
PF: predicated region fallthrough
CT: control target
= control target key end

     0   :  { %11 = vsyncpa [#allocation3], 0  ;;  %s2083_s0 = inlined_call_operand.hbm [shape: bf16[2,24,32], index: 0, kind: input, shape index: {}]   ;;  %s2084_s1 = inlined_call_operand.hbm [shape: f32[1,32], index: 1, kind: input, shape index: {}]   ;;  %s2085_s2 = inlined_call_operand.hbm [shape: f32[1,32], index: 2, kind: input, shape index: {}]   ;;  %s2086_s3 = inlined_call_operand.hbm [shape: bf16[32,96], index: 3, kind: input, shape index: {}]   ;;  %s2087_s4 = inlined_call_operand.hbm [shape: bf16[32,32], index: 4, kind: input, shape index: {}]   ;;  %s2088_s5 = inlined_call_operand.hbm [shape: f32[1,32], index: 5, kind: input, shape index: {}]   ;;  %s2089_s6 = inlined_call_operand.hbm [shape: bf16[2,24,32], index: 6, kind: output, shape index: {}]  }
   0x1   :  { %12 = vsyncpa [#allocation6], 0 }
   0x2   :  { %13 = vsyncpa [#allocation9], 0 }
   0x3   :  { %14 = vsyncpa [#allocation12], 0 }
   0x4   :  { %15 = vsyncpa [#allocation4], 0  ;;  %s1679_s21 = smov [#allocation5]   ;;  %s1515_s25 = scalar_lea.hbm %s2084_s1, 16 }
   0x5   :  { %s34_s22 = sshll.u32 %s1679_s21, 4  ;;  %p1516_p0 = scmp.ne.s32.totalorder %s2084_s1, %s1515_s25  ;;  %s35_s22 = int_to_ptr.vmem [resolvable:$true] %s34_s22 }
   0x6   :  { %p1519_p1 = scmp.lt.u32.totalorder %s1515_s25, %s2084_s1 }
   0x8   :  { %p1521_p2 = pnand %p1519_p1, %p1516_p0 }
   0xa   :  { %1524 = shalt.err (!%p1521_p2)
}
   0xb   :  { %s1525_s30 = scalar_lea.vmem %s35_s22, 16  ;;  %s1529_s7 = scalar_lea.vmem %s35_s22, 32 }
   0xc   :  { %p1526_p3 = scmp.ne.s32.totalorder %s35_s22, %s1525_s30  ;;  %p1530_p4 = scmp.lt.s32.totalorder %s35_s22, %s35_s22 }
   0xd   :  { %p1531_p5 = scmp.lt.s32.totalorder %s1529_s7, %s1525_s30 }
   0xf   :  { %p1532_p6 = por %p1531_p5, %p1530_p4 }
  0x11   :  { %p1533_p7 = pnand %p1532_p6, %p1526_p3 }
  0x13   :  { %1536 = shalt.err (!%p1533_p7)
}
  0x14   :  { %37 = dma.hbm_to_vmem [thread:$0]  %s2084_s1, 16, %s35_s22, [#allocation6]  }
  0x15   :  { %s1680_s10 = smov [#allocation8]   ;;  %s1681_s12 = smov [#allocation2]  }
  0x16   :  { %s53_s11 = sshll.u32 %s1680_s10, 4  ;;  %s21_s13 = sshll.u32 %s1681_s12, 4  ;;  %s54_s11 = int_to_ptr.vmem [resolvable:$true] %s53_s11  ;;  %s22_s13 = int_to_ptr.vmem [resolvable:$true] %s21_s13 }
  0x17   :  { %s1537_s16 = scalar_lea.hbm %s2086_s3, 256 }
  0x18   :  { %p1538_p8 = scmp.ne.s32.totalorder %s2086_s3, %s1537_s16  ;;  %p1541_p9 = scmp.lt.u32.totalorder %s1537_s16, %s2086_s3 }
  0x1a   :  { %p1543_p10 = pnand %p1541_p9, %p1538_p8 }
  0x1c   :  { %1546 = shalt.err (!%p1543_p10)
}
  0x1d   :  { %s1547_s1 = scalar_lea.vmem %s54_s11, 256  ;;  %p1552_p12 = scmp.lt.s32.totalorder %s54_s11, %s54_s11 }
  0x1e   :  { %p1548_p11 = scmp.ne.s32.totalorder %s54_s11, %s1547_s1  ;;  %p1553_p13 = scmp.lt.s32.totalorder %s1547_s1, %s1547_s1 }
  0x20   :  { %p1554_p0 = por %p1553_p13, %p1552_p12 }
  0x22   :  { %p1555_p1 = pnand %p1554_p0, %p1548_p11 }
  0x24   :  { %1558 = shalt.err (!%p1555_p1)
}
  0x25   :  { %s1682_s21 = smov 64   ;;  %s1683_s22 = smov 4  }
  0x26   :  { %59 = dma.hbm_to_vmem [thread:$0]  %s2086_s3, 256, %s54_s11, [#allocation9], %s1682_s21, %s1682_s21, %s1683_s22  }
  0x27   :  { %s1559_s27 = scalar_lea.hbm %s2083_s0, 384 }
  0x28   :  { %p1560_p2 = scmp.ne.s32.totalorder %s2083_s0, %s1559_s27  ;;  %p1563_p3 = scmp.lt.u32.totalorder %s1559_s27, %s2083_s0 }
  0x2a   :  { %p1565_p4 = pnand %p1563_p3, %p1560_p2 }
  0x2c   :  { %1568 = shalt.err (!%p1565_p4)
}
  0x2d   :  { %s1569_s8 = scalar_lea.vmem %s22_s13, 384  ;;  %p1574_p6 = scmp.lt.s32.totalorder %s22_s13, %s22_s13 }
  0x2e   :  { %p1570_p5 = scmp.ne.s32.totalorder %s22_s13, %s1569_s8  ;;  %p1575_p7 = scmp.lt.s32.totalorder %s1569_s8, %s1569_s8 }
  0x30   :  { %p1576_p8 = por %p1575_p7, %p1574_p6 }
  0x32   :  { %p1577_p9 = pnand %p1576_p8, %p1570_p5 }
  0x34   :  { %1580 = shalt.err (!%p1577_p9)
}
  0x35   :  { %27 = dma.hbm_to_vmem [thread:$0]  %s2083_s0, 384, %s22_s13, [#allocation3], %s1682_s21, %s1682_s21, %s1683_s22  }
  0x36   :  { %s1684_s10 = smov [#allocation7]   ;;  %s1685_s12 = smov [#allocation10]  }
  0x37   :  { %s44_s11 = sshll.u32 %s1684_s10, 4  ;;  %s65_s14 = sshll.u32 %s1685_s12, 4  ;;  %s45_s11 = int_to_ptr.vmem [resolvable:$true] %s44_s11  ;;  %s66_s14 = int_to_ptr.vmem [resolvable:$true] %s65_s14 }
  0x38   :  { %s1581_s17 = scalar_lea.hbm %s2085_s2, 16 }
  0x39   :  { %p1582_p10 = scmp.ne.s32.totalorder %s2085_s2, %s1581_s17  ;;  %p1585_p11 = scmp.lt.u32.totalorder %s1581_s17, %s2085_s2 }
  0x3b   :  { %p1587_p12 = pnand %p1585_p11, %p1582_p10 }
  0x3d   :  { %1590 = shalt.err (!%p1587_p12)
}
  0x3e   :  { %s1591_s0 = scalar_lea.vmem %s45_s11, 16  ;;  %s1595_s13 = scalar_lea.vmem %s45_s11, 32 }
  0x3f   :  { %p1592_p13 = scmp.ne.s32.totalorder %s45_s11, %s1591_s0  ;;  %p1596_p0 = scmp.lt.s32.totalorder %s45_s11, %s45_s11 }
  0x40   :  { %p1597_p1 = scmp.lt.s32.totalorder %s1595_s13, %s1591_s0 }
  0x42   :  { %p1598_p2 = por %p1597_p1, %p1596_p0 }
  0x44   :  { %p1599_p3 = pnand %p1598_p2, %p1592_p13 }
  0x46   :  { %1602 = shalt.err (!%p1599_p3)
}
  0x47   :  { %47 = dma.hbm_to_vmem [thread:$0]  %s2085_s2, 16, %s45_s11, [#allocation6]  }
  0x48   :  { %s1603_s27 = scalar_lea.hbm %s2087_s4, 256 }
  0x49   :  { %p1604_p4 = scmp.ne.s32.totalorder %s2087_s4, %s1603_s27  ;;  %p1607_p5 = scmp.lt.u32.totalorder %s1603_s27, %s2087_s4 }
  0x4b   :  { %p1609_p6 = pnand %p1607_p5, %p1604_p4 }
  0x4d   :  { %1612 = shalt.err (!%p1609_p6)
}
  0x4e   :  { %s1613_s8 = scalar_lea.vmem %s66_s14, 256  ;;  %p1618_p8 = scmp.lt.s32.totalorder %s66_s14, %s66_s14 }
  0x4f   :  { %p1614_p7 = scmp.ne.s32.totalorder %s66_s14, %s1613_s8  ;;  %p1619_p9 = scmp.lt.s32.totalorder %s1613_s8, %s1613_s8 }
  0x51   :  { %p1620_p10 = por %p1619_p9, %p1618_p8 }
  0x53   :  { %p1621_p11 = pnand %p1620_p10, %p1614_p7 }
  0x55   :  { %1624 = shalt.err (!%p1621_p11)
}
  0x56   :  { %71 = dma.hbm_to_vmem [thread:$0]  %s2087_s4, 256, %s66_s14, [#allocation9], %s1682_s21, %s1682_s21, %s1683_s22  }
  0x57   :  { %s1686_s9 = smov [#allocation11]   ;;  %s1625_s15 = scalar_lea.hbm %s2088_s5, 16 }
  0x58   :  { %s78_s10 = sshll.u32 %s1686_s9, 4  ;;  %p1626_p12 = scmp.ne.s32.totalorder %s2088_s5, %s1625_s15  ;;  %s79_s10 = int_to_ptr.vmem [resolvable:$true] %s78_s10 }
  0x59   :  { %p1629_p13 = scmp.lt.u32.totalorder %s1625_s15, %s2088_s5 }
  0x5b   :  { %p1631_p0 = pnand %p1629_p13, %p1626_p12 }
  0x5d   :  { %1634 = shalt.err (!%p1631_p0)
}
  0x5e   :  { %s1635_s20 = scalar_lea.vmem %s79_s10, 16  ;;  %s1639_s4 = scalar_lea.vmem %s79_s10, 32 }
  0x5f   :  { %p1636_p1 = scmp.ne.s32.totalorder %s79_s10, %s1635_s20  ;;  %p1640_p2 = scmp.lt.s32.totalorder %s79_s10, %s79_s10 }
  0x60   :  { %p1641_p3 = scmp.lt.s32.totalorder %s1639_s4, %s1635_s20 }
  0x62   :  { %p1642_p4 = por %p1641_p3, %p1640_p2 }
  0x64   :  { %p1643_p5 = pnand %p1642_p4, %p1636_p1 }
  0x66   :  { %1646 = shalt.err (!%p1643_p5)
}
  0x67   :  { %81 = dma.hbm_to_vmem [thread:$0]  %s2088_s5, 16, %s79_s10, [#allocation12]  }
  0x68   :  { %1669 = dma.done.wait [#allocation3], 384  }
  0x69   :  { %1670 = vsyncadd [#allocation3], 4294966912 }
  0x6a   :  { %1671 = dma.done.wait [#allocation6], 32  }
  0x6b   :  { %1672 = vsyncadd [#allocation6], 4294967264 }
  0x6c   :  { %1673 = dma.done.wait [#allocation9], 512  }
  0x6d   :  { %1674 = vsyncadd [#allocation9], 4294966784 }
  0x6e   :  { %1675 = dma.done.wait [#allocation12], 16  }
  0x6f   :  { %1676 = vsyncadd [#allocation12], 4294967280  ;;  %v1257_v0 = vld [vmem:[#allocation2] sm:$0xff]   ;;  %vm115_vm0 = vcmask 261120   ;;  %v1268_v1 = vld [vmem:[#allocation2 + $0x8] sm:$0xff]   ;;  %v1687_v46 = vmov 0.0  }
  0x70   :  { %v1269_v2 = vld [vmem:[#allocation2 + $0x10] sm:$0xff]   ;;  %v1811_v3 = vunpack.c.l.bf16 %v1257_v0  ;;  %v1813_v4 = vunpack.c.l.bf16 %v1268_v1  ;;  %v1815_v5 = vunpack.c.h.bf16 %v1257_v0  ;;  %v1817_v6 = vunpack.c.h.bf16 %v1268_v1  ;;  %v1451_v45 = vld [vmem:[#allocation8] sm:$0xff]   ;;  %1312 = vmatprep.subr.bf16.mxu1 %v1687_v46  ;;  %v1452_v47 = vld [vmem:[#allocation8 + $0x8] sm:$0xff]   ;;  %s1689_s5 = smov 96   ;;  %s1690_s0 = smov 80  }
  0x71   :  { %v1827_v11 = vunpack.c.l.bf16 %v1269_v2  ;;  %v1829_v12 = vunpack.c.h.bf16 %v1269_v2  ;;  %1313 = vmatpush3.bf16.msra.mxu1 %v1451_v45  ;;  %vm1688_vm1 = vmmov 0   ;;  %vm339_vm2 = vcmask 130048   ;;  %s1691_s13 = smov 112   ;;  %s1692_s23 = smov 48  }
  0x72   :  { %v116_v7 = vsel %vm115_vm0, %v1811_v3, 0.0  ;;  %v122_v8 = vsel %vm115_vm0, %v1813_v4, 0.0  ;;  %v119_v9 = vsel %vm115_vm0, %v1815_v5, 0.0  ;;  %v125_v10 = vsel %vm115_vm0, %v1817_v6, 0.0  ;;  %1314 = vmatprep.subr.bf16.mxu1 %v1687_v46  ;;  %1316 = vmatprep.mubr.msk.bf16.mxu1 %vm1688_vm1, %v1687_v46  ;;  %s1693_s24 = smov 16   ;;  %s1694_s25 = smov [#allocation13]  }
  0x73   :  { %117 = vadd.xlane.f32.xlu0 %v116_v7  ;;  %123 = vadd.xlane.f32.xlu1 %v122_v8  ;;  %v128_v13 = vsel %vm115_vm0, %v1827_v11, 0.0  ;;  %v131_v14 = vsel %vm115_vm0, %v1829_v12, 0.0  ;;  %v1207_v8 = vld [vmem:[#allocation5] ss:$0 sm:$0xff]  ;;  %vm474_vm4 = vcmask 195584   ;;  %vm556_vm5 = vcmask 1043456  }
  0x74   :  { %vm1180_vm6 = vcmask 257024   ;;  %s1192_s26 = sshll.u32 %s1694_s25, 4  ;;  %s1193_s26 = int_to_ptr.vmem [resolvable:$true] %s1192_s26 }
  0x75   :  { %1315 = vmatpush3.bf16.msra.mxu1 %v1452_v47  ;;  %s1647_s27 = scalar_lea.vmem %s1193_s26, 384  ;;  %p1652_p7 = scmp.lt.s32.totalorder %s1193_s26, %s1193_s26 }
  0x76   :  { %p1648_p6 = scmp.ne.s32.totalorder %s1193_s26, %s1647_s27  ;;  %p1653_p8 = scmp.lt.s32.totalorder %s1647_s27, %s1647_s27 }
  0x77   :  { %120 = vadd.xlane.f32.xlu0 %v119_v9  ;;  %126 = vadd.xlane.f32.xlu1 %v125_v10 }
  0x78   :  { %p1654_p9 = por %p1653_p8, %p1652_p7 }
  0x7a   :  { %p1655_p10 = pnand %p1654_p9, %p1648_p6 }
  0x7b   :  { %129 = vadd.xlane.f32.xlu0 %v128_v13  ;;  %132 = vadd.xlane.f32.xlu1 %v131_v14 }
 0x100   :  { %v118_v15 = vpop.xlane.xlu0 %117  ;;  %v124_v16 = vpop.xlane.xlu1 %123 }
 0x101   :  { %v135_v17 = vmul.f32 0.03125, %v118_v15  ;;  %v137_v18 = vmul.f32 0.03125, %v124_v16  ;;  %v1208_v15 = vld [vmem:[#allocation7] ss:$0 sm:$0xff] }
 0x103   :  { %v1836_v19 = vsub.f32 %v1811_v3, %v135_v17  ;;  %v1839_v20 = vsub.f32 %v1813_v4, %v137_v18 }
 0x104   :  { %v121_v21 = vpop.xlane.xlu0 %120  ;;  %v127_v22 = vpop.xlane.xlu1 %126 }
 0x105   :  { %v136_v23 = vmul.f32 0.03125, %v121_v21  ;;  %v138_v24 = vmul.f32 0.03125, %v127_v22  ;;  %v147_v25 = vmul.f32 %v1836_v19, %v1836_v19  ;;  %v149_v26 = vmul.f32 %v1839_v20, %v1839_v20 }
 0x107   :  { %v142_v27 = vsub.f32 %v1815_v5, %v136_v23  ;;  %v1847_v28 = vsub.f32 %v1817_v6, %v138_v24  ;;  %v153_v29 = vsel %vm115_vm0, %v147_v25, 0.0  ;;  %v159_v32 = vsel %vm115_vm0, %v149_v26, 0.0 }
 0x108   :  { %154 = vadd.xlane.f32.xlu0 %v153_v29  ;;  %v130_v30 = vpop.xlane.xlu0 %129  ;;  %v133_v31 = vpop.xlane.xlu1 %132 }
 0x109   :  { %v139_v33 = vmul.f32 0.03125, %v130_v30  ;;  %v140_v34 = vmul.f32 0.03125, %v133_v31  ;;  %v148_v35 = vmul.f32 %v142_v27, %v142_v27  ;;  %v150_v36 = vmul.f32 %v1847_v28, %v1847_v28 }
 0x10b   :  { %v145_v37 = vsub.f32 %v1827_v11, %v139_v33  ;;  %v1855_v38 = vsub.f32 %v1829_v12, %v140_v34  ;;  %v156_v39 = vsel %vm115_vm0, %v148_v35, 0.0  ;;  %v162_v40 = vsel %vm115_vm0, %v150_v36, 0.0 }
 0x10c   :  { %160 = vadd.xlane.f32.xlu0 %v159_v32  ;;  %157 = vadd.xlane.f32.xlu1 %v156_v39 }
 0x10d   :  { %v151_v41 = vmul.f32 %v145_v37, %v145_v37  ;;  %v152_v42 = vmul.f32 %v1855_v38, %v1855_v38 }
 0x10f   :  { %v165_v43 = vsel %vm115_vm0, %v151_v41, 0.0  ;;  %v168_v44 = vsel %vm115_vm0, %v152_v42, 0.0 }
 0x110   :  { %163 = vadd.xlane.f32.xlu1 %v162_v40  ;;  %166 = vadd.xlane.f32.xlu0 %v165_v43 }
 0x114   :  { %169 = vadd.xlane.f32.xlu1 %v168_v44 }
 0x195   :  { %v155_v48 = vpop.xlane.xlu0 %154 }
 0x196   :  { %v171_v49 = vmul.f32 0.03125, %v155_v48 }
 0x198   :  { %v177_v50 = vadd.f32 1e-05, %v171_v49 }
 0x199   :  { %v158_v51 = vpop.xlane.xlu1 %157  ;;  %v161_v52 = vpop.xlane.xlu0 %160 }
 0x19a   :  { %1455 = vrsqrt.f32 %v177_v50  ;;  %v172_v53 = vmul.f32 0.03125, %v158_v51  ;;  %v173_v54 = vmul.f32 0.03125, %v161_v52 }
 0x19c   :  { %v178_v55 = vadd.f32 1e-05, %v172_v53  ;;  %v179_v56 = vadd.f32 1e-05, %v173_v54 }
 0x19d   :  { %v164_v57 = vpop.xlane.xlu1 %163  ;;  %v167_v58 = vpop.xlane.xlu0 %166 }
 0x19e   :  { %1457 = vrsqrt.f32 %v178_v55  ;;  %v174_v59 = vmul.f32 0.03125, %v164_v57  ;;  %v175_v60 = vmul.f32 0.03125, %v167_v58 }
 0x19f   :  { %1459 = vrsqrt.f32 %v179_v56 }
 0x1a0   :  { %v180_v61 = vadd.f32 1e-05, %v174_v59  ;;  %v181_v62 = vadd.f32 1e-05, %v175_v60 }
 0x1a1   :  { %v170_v63 = vpop.xlane.xlu1 %169 }
 0x1a2   :  { %1461 = vrsqrt.f32 %v180_v61  ;;  %v176_v0 = vmul.f32 0.03125, %v170_v63 }
 0x1a3   :  { %1463 = vrsqrt.f32 %v181_v62 }
 0x1a4   :  { %v1456_v1 = vpop.eup %1455  ;;  %v182_v2 = vadd.f32 1e-05, %v176_v0 }
 0x1a5   :  { %v189_v7 = vmul.f32 %v1456_v1, %v1836_v19 }
 0x1a6   :  { %1465 = vrsqrt.f32 %v182_v2 }
 0x1a7   :  { %v201_v13 = vmul.f32 %v1207_v8, %v189_v7 }
 0x1a8   :  { %v1458_v9 = vpop.eup %1457 }
 0x1a9   :  { %v190_v10 = vmul.f32 %v1458_v9, %v142_v27  ;;  %v1460_v14 = vpop.eup %1459  ;;  %v213_v23 = vadd.f32 %v1208_v15, %v201_v13 }
 0x1aa   :  { %v191_v21 = vmul.f32 %v1460_v14, %v1839_v20 }
 0x1ab   :  { %v202_v16 = vmul.f32 %v1207_v8, %v190_v10  ;;  %v330_v10 = vlaneseq }
 0x1ac   :  { %v1462_v17 = vpop.eup %1461  ;;  %v203_v27 = vmul.f32 %v1207_v8, %v191_v21 }
 0x1ad   :  { %v1464_v18 = vpop.eup %1463  ;;  %v192_v22 = vmul.f32 %v1462_v17, %v1847_v28  ;;  %v214_v24 = vadd.f32 %v1208_v15, %v202_v16  ;;  %v1906_v13 = vand.u32 127, %v330_v10 }
 0x1ae   :  { %v193_v25 = vmul.f32 %v1464_v18, %v145_v37  ;;  %v215_v20 = vadd.f32 %v1208_v15, %v203_v27 }
 0x1af   :  { %v219_v26 = vpack.c.bf16 %v214_v24, %v213_v23  ;;  %v204_v29 = vmul.f32 %v1207_v8, %v192_v22  ;;  %vm332_vm3 = vcmp.lt.s32.totalorder %v1906_v13, 17 }
 0x1b0   :  { %v1466_v19 = vpop.eup %1465  ;;  %v205_v31 = vmul.f32 %v1207_v8, %v193_v25 }
 0x1b1   :  { %v194_v30 = vmul.f32 %v1466_v19, %v1855_v38  ;;  %1317 = vmatmul.mubr.msk.bf16.vlgmr.msra.gmra.mrb[0].mxu1 %vm115_vm0, %v219_v26  ;;  %v216_v32 = vadd.f32 %v1208_v15, %v204_v29 }
 0x1b2   :  { %1320 = vmatprep.mubr.msk.bf16.mxu1 %vm1688_vm1, %v1687_v46  ;;  %v217_v34 = vadd.f32 %v1208_v15, %v205_v31 }
 0x1b3   :  { %v206_v33 = vmul.f32 %v1207_v8, %v194_v30  ;;  %v1246_v35 = vpack.c.bf16 %v216_v32, %v215_v20 }
 0x1b4   :  { %v221_v37 = vpack.c.bf16 %v217_v34, %v216_v32 }
 0x1b5   :  { %v218_v28 = vadd.f32 %v1208_v15, %v206_v33 }
 0x1b6   :  { %v231_v39 = vunpack.c.h.b16 %v221_v37 }
 0x1b7   :  { %v222_v36 = vpack.c.bf16 %v218_v28, %v218_v28 }
 0x1b9   :  { %1321 = vmatmul.mubr.msk.bf16.gmra.mrb[4].mxu1 %vm115_vm0, %v1246_v35  ;;  %v232_v38 = vunpack.c.l.b16 %v222_v36 }
 0x1ba   :  { %1324 = vmatprep.mubr.msk.bf16.mxu1 %vm1688_vm1, %v1687_v46 }
 0x1bb   :  { %v239_v40 = vpack.c.b16 %v232_v38, %v231_v39 }
 0x1c1   :  { %1325 = vmatmul.mubr.msk.bf16.gmra.mrb[8].mxu1 %vm115_vm0, %v239_v40 }
 0x284   :  { %v295_v41 = vpop.f32.mrb[0].mxu1 }
 0x285   :  { %v1318_v42 = vpop.f32.mrb[1].mxu1 }
 0x286   :  { %v298_v43 = vpop.f32.mrb[2].mxu1 }
 0x287   :  { %v1878_v44 = vpack.c.bf16 %v298_v43, %v295_v41  ;;  %v1319_v45 = vpop.f32.mrb[3].mxu1 }
 0x289   :  { %335 = vrot.lane.b32.xlu0 %v1878_v44, %s1689_s5  ;;  %1332 = vmatprep.mubr.msk.bf16.mxu1 %vm339_vm2, %v1878_v44 }
 0x28c   :  { %v303_v47 = vpop.f32.mrb[4].mxu1 }
 0x28d   :  { %v1883_v48 = vpack.c.bf16 %v303_v47, %v303_v47  ;;  %v1322_v49 = vpop.f32.mrb[5].mxu1 }
 0x28e   :  { %v306_v50 = vpop.f32.mrb[6].mxu1 }
 0x28f   :  { %v319_v51 = vpack.c.bf16 %v306_v50, %v303_v47  ;;  %337 = vrot.lane.b32.xlu1 %v1883_v48, %s1689_s5  ;;  %v1323_v52 = vpop.f32.mrb[7].mxu1 }
 0x291   :  { %v327_v58 = vunpack.c.h.b16 %v319_v51 }
 0x294   :  { %v311_v53 = vpop.f32.mrb[8].mxu1 }
 0x295   :  { %v1326_v54 = vpop.f32.mrb[9].mxu1 }
 0x296   :  { %v314_v55 = vpop.f32.mrb[10].mxu1 }
 0x297   :  { %v320_v56 = vpack.c.bf16 %v314_v55, %v311_v53  ;;  %v1327_v57 = vpop.f32.mrb[11].mxu1  ;;  %v1891_v61 = vpack.c.bf16 %v314_v55, %v314_v55 }
 0x299   :  { %v328_v59 = vunpack.c.l.b16 %v320_v56 }
 0x29b   :  { %v1886_v60 = vpack.c.b16 %v328_v59, %v327_v58 }
 0x29d   :  { %402 = vrot.lane.b32.xlu1 %v1886_v60, %s1689_s5  ;;  %1340 = vmatprep.mubr.msk.bf16.mxu0 %vm339_vm2, %v1886_v60 }
 0x2a1   :  { %404 = vrot.lane.b32.xlu1 %v1891_v61, %s1689_s5 }
 0x2fb   :  { %v336_v62 = vpop.permute.xlu0 %335 }
 0x2fc   :  { %v347_v63 = vsel %vm339_vm2, %v336_v62, 0  ;;  %1408 = vmatprep.subr.msk.bf16.mxu1 %vm339_vm2, %v336_v62 }
 0x2fd   :  { %1329 = vmatpush3.bf16.xpose.msra.mxu1 %v347_v63 }
 0x301   :  { %v338_v0 = vpop.permute.xlu1 %337 }
 0x302   :  { %1409 = vmatprep.subr.msk.bf16.mxu1 %vm339_vm2, %v338_v0  ;;  %v350_v1 = vsel %vm339_vm2, %v338_v0, 0 }
 0x305   :  { %1331 = vmatpush3.bf16.xpose.msra.mxu1 %v350_v1 }
 0x30c   :  { %1333 = vmatmul.mubr.msk.bf16.vlgmr.msra.gmra.mrb[12].mxu1 %vm339_vm2, %v1883_v48 }
 0x30f   :  { %v403_v2 = vpop.permute.xlu1 %402 }
 0x310   :  { %1410 = vmatprep.subr.msk.bf16.mxu0 %vm339_vm2, %v403_v2  ;;  %v413_v7 = vsel %vm339_vm2, %v403_v2, 0 }
 0x311   :  { %1337 = vmatpush3.bf16.xpose.msra.mxu0 %v413_v7 }
 0x313   :  { %v405_v8 = vpop.permute.xlu1 %404 }
 0x314   :  { %1411 = vmatprep.subr.msk.bf16.mxu0 %vm339_vm2, %v405_v8  ;;  %v416_v9 = vsel %vm339_vm2, %v405_v8, 0 }
 0x319   :  { %1339 = vmatpush3.bf16.xpose.msra.mxu0 %v416_v9 }
 0x320   :  { %1341 = vmatmul.mubr.msk.bf16.vlgmr.msra.gmra.mrb[0].mxu0 %vm339_vm2, %v1891_v61 }
 0x3df   :  { %v1334_v14 = vpop.f32.mrb[12].mxu1 }
 0x3e0   :  { %v470_v15 = vsel %vm332_vm3, %v1334_v14, -1e+30  ;;  %v386_v16 = vpop.f32.mrb[13].mxu1 }
 0x3e1   :  { %v1335_v17 = vpop.f32.mrb[14].mxu1  ;;  %v481_v18 = vsel %vm474_vm4, %v470_v15, -inf  ;;  %v468_v21 = vsel %vm332_vm3, %v386_v16, -1e+30 }
 0x3e2   :  { %482 = vmax.xlane.f32.xlu0 %v481_v18  ;;  %v389_v22 = vpop.f32.mrb[15].mxu1  ;;  %v475_v25 = vsel %vm474_vm4, %v468_v21, -inf }
 0x3e3   :  { %v469_v23 = vsel %vm332_vm3, %v389_v22, -1e+30 }
 0x3e4   :  { %v478_v24 = vsel %vm474_vm4, %v469_v23, -inf }
 0x3e5   :  { %479 = vmax.xlane.f32.xlu1 %v478_v24 }
 0x3e6   :  { %476 = vmax.xlane.f32.xlu0 %v475_v25 }
 0x3f3   :  { %v1342_v26 = vpop.f32.mrb[0].mxu0 }
 0x3f4   :  { %v473_v29 = vsel %vm332_vm3, %v1342_v26, -1e+30  ;;  %v452_v19 = vpop.f32.mrb[1].mxu0 }
 0x3f5   :  { %v471_v30 = vsel %vm332_vm3, %v452_v19, -1e+30  ;;  %v1343_v27 = vpop.f32.mrb[2].mxu0  ;;  %v490_v31 = vsel %vm474_vm4, %v473_v29, -inf }
 0x3f6   :  { %v455_v32 = vpop.f32.mrb[3].mxu0  ;;  %491 = vmax.xlane.f32.xlu1 %v490_v31  ;;  %v484_v33 = vsel %vm474_vm4, %v471_v30, -inf }
 0x3f7   :  { %v472_v20 = vsel %vm332_vm3, %v455_v32, -1e+30  ;;  %485 = vmax.xlane.f32.xlu0 %v484_v33 }
 0x3f8   :  { %v487_v34 = vsel %vm474_vm4, %v472_v20, -inf }
 0x3fb   :  { %488 = vmax.xlane.f32.xlu0 %v487_v34 }
 0x407   :  { %547 = vrot.lane.b32.xlu1 %v1883_v48, %s1682_s21 }
 0x40b   :  { %608 = vrot.lane.b32.xlu1 %v1886_v60, %s1682_s21 }
 0x40f   :  { %674 = vrot.lane.b32.xlu1 %v1878_v44, %s1690_s0 }
 0x411   :  { %545 = vrot.lane.b32.xlu0 %v1878_v44, %s1682_s21 }
 0x46f   :  { %v483_v28 = vpop.xlane.xlu0 %482 }
 0x470   :  { %v495_v35 = vsub.f32 %v470_v15, %v483_v28 }
 0x472   :  { %v503_v36 = vmul.f32 1.442695, %v495_v35  ;;  %v480_v37 = vpop.xlane.xlu1 %479 }
 0x473   :  { %v494_v38 = vsub.f32 %v469_v23, %v480_v37  ;;  %v477_v39 = vpop.xlane.xlu0 %476 }
 0x474   :  { %1467 = vpow2.f32 %v503_v36  ;;  %v493_v40 = vsub.f32 %v468_v21, %v477_v39 }
 0x475   :  { %v501_v41 = vmul.f32 1.442695, %v494_v38 }
 0x476   :  { %v499_v42 = vmul.f32 1.442695, %v493_v40 }
 0x477   :  { %1469 = vpow2.f32 %v501_v41 }
 0x478   :  { %1471 = vpow2.f32 %v499_v42 }
 0x47e   :  { %v1935_v43 = vpop.eup %1467 }
 0x47f   :  { %v517_v45 = vsel %vm474_vm4, %v1935_v43, 0.0 }
 0x480   :  { %518 = vadd.xlane.f32.xlu0 %v517_v45 }
 0x481   :  { %v1939_v47 = vpop.eup %1469 }
 0x482   :  { %v1941_v49 = vpop.eup %1471  ;;  %v514_v50 = vsel %vm474_vm4, %v1939_v47, 0.0 }
 0x483   :  { %515 = vadd.xlane.f32.xlu1 %v514_v50  ;;  %v492_v51 = vpop.xlane.xlu1 %491  ;;  %v511_v52 = vsel %vm474_vm4, %v1941_v49, 0.0 }
 0x484   :  { %512 = vadd.xlane.f32.xlu0 %v511_v52  ;;  %v486_v53 = vpop.xlane.xlu0 %485  ;;  %v498_v63 = vsub.f32 %v473_v29, %v492_v51 }
 0x485   :  { %v496_v2 = vsub.f32 %v471_v30, %v486_v53 }
 0x486   :  { %v509_v1 = vmul.f32 1.442695, %v498_v63 }
 0x487   :  { %v548_v54 = vpop.permute.xlu1 %547  ;;  %v505_v8 = vmul.f32 1.442695, %v496_v2 }
 0x488   :  { %v489_v55 = vpop.xlane.xlu0 %488  ;;  %v558_v62 = vsel %vm556_vm5, %v548_v54, 0  ;;  %1473 = vpow2.f32 %v509_v1 }
 0x489   :  { %v497_v0 = vsub.f32 %v472_v20, %v489_v55 }
 0x48b   :  { %v609_v56 = vpop.permute.xlu1 %608  ;;  %v507_v7 = vmul.f32 1.442695, %v497_v0 }
 0x48c   :  { %v546_v57 = vpop.permute.xlu0 %545 }
 0x48d   :  { %1344 = vmatprep.subr.bf16.mxu1 %v546_v57  ;;  %1475 = vpow2.f32 %v507_v7 }
 0x48e   :  { %1345 = vmatpush3.bf16.msra.mxu1 %v546_v57  ;;  %1477 = vpow2.f32 %v505_v8 }
 0x48f   :  { %1412 = vmatprep.subr.msk.bf16.mxu1 %vm556_vm5, %v548_v54  ;;  %v675_v58 = vpop.permute.xlu1 %674 }
 0x490   :  { %v685_v59 = vsel %vm339_vm2, %v675_v58, 0  ;;  %1414 = vmatprep.subr.msk.bf16.mxu0 %vm339_vm2, %v675_v58 }
 0x491   :  { %1361 = vmatpush3.bf16.xpose.msra.mxu0 %v685_v59 }
 0x492   :  { %1347 = vmatpush3.bf16.msra.mxu1 %v558_v62  ;;  %v1474_v9 = vpop.eup %1473 }
 0x493   :  { %1352 = vmatprep.subr.bf16.mxu1 %v609_v56  ;;  %v526_v14 = vsel %vm474_vm4, %v1474_v9, 0.0 }
 0x494   :  { %676 = vrot.lane.b32.xlu1 %v1883_v48, %s1690_s0 }
 0x497   :  { %v1476_v10 = vpop.eup %1475 }
 0x498   :  { %v1478_v15 = vpop.eup %1477  ;;  %v523_v16 = vsel %vm474_vm4, %v1476_v10, 0.0 }
 0x499   :  { %v520_v17 = vsel %vm474_vm4, %v1478_v15, 0.0 }
 0x49a   :  { %610 = vrot.lane.b32.xlu0 %v1891_v61, %s1682_s21 }
 0x4b8   :  { %527 = vadd.xlane.f32.xlu1 %v526_v14 }
 0x4b9   :  { %524 = vadd.xlane.f32.xlu0 %v523_v16 }
 0x4bc   :  { %521 = vadd.xlane.f32.xlu1 %v520_v17 }
 0x4cd   :  { %670 = vrot.lane.b32.xlu1 %v1878_v44, %s1691_s13 }
 0x4cf   :  { %742 = vrot.lane.b32.xlu0 %v1886_v60, %s1690_s0 }
 0x4d1   :  { %744 = vrot.lane.b32.xlu1 %v1891_v61, %s1690_s0 }
 0x4d3   :  { %672 = vrot.lane.b32.xlu0 %v1883_v48, %s1691_s13 }
 0x4d5   :  { %740 = vrot.lane.b32.xlu1 %v1891_v61, %s1691_s13 }
 0x4d7   :  { %738 = vrot.lane.b32.xlu0 %v1886_v60, %s1691_s13 }
 0x50d   :  { %v519_v18 = vpop.xlane.xlu0 %518 }
 0x50e   :  { %1479 = vrcp.f32 %v519_v18 }
 0x510   :  { %v516_v21 = vpop.xlane.xlu1 %515 }
 0x511   :  { %1481 = vrcp.f32 %v516_v21  ;;  %v513_v22 = vpop.xlane.xlu0 %512 }
 0x512   :  { %1483 = vrcp.f32 %v513_v22 }
 0x514   :  { %v677_v23 = vpop.permute.xlu1 %676 }
 0x515   :  { %v688_v24 = vsel %vm339_vm2, %v677_v23, 0  ;;  %1415 = vmatprep.subr.msk.bf16.mxu0 %vm339_vm2, %v677_v23  ;;  %v611_v33 = vpop.permute.xlu0 %610 }
 0x516   :  { %1363 = vmatpush3.bf16.xpose.msra.mxu0 %v688_v24  ;;  %v620_v20 = vsel %vm556_vm5, %v611_v33, 0 }
 0x518   :  { %v1480_v25 = vpop.eup %1479 }
 0x519   :  { %v537_v19 = vmul.f32 %v1480_v25, %v1935_v43 }
 0x51b   :  { %v1482_v26 = vpop.eup %1481  ;;  %v542_v32 = vpack.c.bf16 %v537_v19, %v537_v19 }
 0x51c   :  { %v1484_v29 = vpop.eup %1483  ;;  %v536_v30 = vmul.f32 %v1482_v26, %v1939_v47 }
 0x51d   :  { %v535_v27 = vmul.f32 %v1484_v29, %v1941_v49 }
 0x51f   :  { %v541_v31 = vpack.c.bf16 %v536_v30, %v535_v27 }
 0x521   :  { %1348 = vmatprep.mubr.msk.bf16.mxu1 %vm474_vm4, %v541_v31 }
 0x522   :  { %1349 = vmatmul.mubr.msk.bf16.vlgmr.msra.gmra.mrb[16].mxu1 %vm474_vm4, %v542_v32 }
 0x523   :  { %1353 = vmatpush3.bf16.msra.mxu1 %v609_v56 }
 0x524   :  { %1413 = vmatprep.subr.msk.bf16.mxu1 %vm556_vm5, %v611_v33 }
 0x527   :  { %1355 = vmatpush3.bf16.msra.mxu1 %v620_v20 }
 0x545   :  { %v528_v34 = vpop.xlane.xlu1 %527 }
 0x546   :  { %v525_v28 = vpop.xlane.xlu0 %524  ;;  %1485 = vrcp.f32 %v528_v34 }
 0x547   :  { %1487 = vrcp.f32 %v525_v28 }
 0x549   :  { %v522_v35 = vpop.xlane.xlu1 %521 }
 0x54a   :  { %1489 = vrcp.f32 %v522_v35  ;;  %v743_v36 = vpop.permute.xlu0 %742 }
 0x54b   :  { %1416 = vmatprep.subr.msk.bf16.mxu1 %vm339_vm2, %v743_v36  ;;  %v753_v50 = vsel %vm339_vm2, %v743_v36, 0 }
 0x54d   :  { %v671_v37 = vpop.permute.xlu1 %670 }
 0x54e   :  { %v673_v38 = vpop.permute.xlu0 %672  ;;  %1364 = vmatprep.mubr.msk.bf16.mxu0 %vm339_vm2, %v671_v37 }
 0x54f   :  { %1365 = vmatmul.mubr.msk.bf16.vlgmr.msra.gmra.mrb[4].mxu0 %vm339_vm2, %v673_v38 }
 0x550   :  { %v1486_v39 = vpop.eup %1485 }
 0x551   :  { %v1488_v40 = vpop.eup %1487  ;;  %v540_v42 = vmul.f32 %v1486_v39, %v1474_v9  ;;  %v745_v52 = vpop.permute.xlu1 %744 }
 0x552   :  { %v539_v45 = vmul.f32 %v1488_v40, %v1476_v10  ;;  %v739_v51 = vpop.permute.xlu0 %738  ;;  %v756_v53 = vsel %vm339_vm2, %v745_v52, 0 }
 0x553   :  { %v544_v49 = vpack.c.bf16 %v540_v42, %v540_v42 }
 0x554   :  { %v1490_v41 = vpop.eup %1489 }
 0x555   :  { %v538_v43 = vmul.f32 %v1490_v41, %v1478_v15  ;;  %v741_v54 = vpop.permute.xlu1 %740 }
 0x557   :  { %v543_v47 = vpack.c.bf16 %v539_v45, %v538_v43 }
 0x559   :  { %1356 = vmatprep.mubr.msk.bf16.mxu1 %vm474_vm4, %v543_v47 }
 0x55a   :  { %1357 = vmatmul.mubr.msk.bf16.vlgmr.msra.gmra.mrb[20].mxu1 %vm474_vm4, %v544_v49 }
 0x55b   :  { %1369 = vmatpush3.bf16.xpose.msra.mxu1 %v753_v50  ;;  %1372 = vmatprep.mubr.msk.bf16.mxu1 %vm339_vm2, %v739_v51 }
 0x55c   :  { %1417 = vmatprep.subr.msk.bf16.mxu1 %vm339_vm2, %v745_v52 }
 0x563   :  { %1371 = vmatpush3.bf16.xpose.msra.mxu1 %v756_v53 }
 0x56a   :  { %1373 = vmatmul.mubr.msk.bf16.vlgmr.msra.gmra.mrb[24].mxu1 %vm339_vm2, %v741_v54 }
 0x5f5   :  { %v1985_v55 = vpop.f32.mrb[16].mxu1 }
 0x5f6   :  { %v1987_v56 = vpop.f32.mrb[17].mxu1 }
 0x5f7   :  { %v1351_v57 = vpop.f32.mrb[18].mxu1 }
 0x5f8   :  { %v1989_v58 = vpop.f32.mrb[19].mxu1 }
 0x622   :  { %v1366_v59 = vpop.f32.mrb[4].mxu0 }
 0x623   :  { %v724_v62 = vpop.f32.mrb[5].mxu0  ;;  %v808_v7 = vsel %vm332_vm3, %v1366_v59, -1e+30 }
 0x624   :  { %v806_v63 = vsel %vm332_vm3, %v724_v62, -1e+30  ;;  %v1367_v0 = vpop.f32.mrb[6].mxu0  ;;  %v818_v10 = vsel %vm474_vm4, %v808_v7, -inf }
 0x625   :  { %v727_v1 = vpop.f32.mrb[7].mxu0  ;;  %v812_v2 = vsel %vm474_vm4, %v806_v63, -inf }
 0x626   :  { %v807_v8 = vsel %vm332_vm3, %v727_v1, -1e+30  ;;  %813 = vmax.xlane.f32.xlu0 %v812_v2 }
 0x627   :  { %v815_v9 = vsel %vm474_vm4, %v807_v8, -inf }
 0x628   :  { %816 = vmax.xlane.f32.xlu1 %v815_v9 }
 0x62a   :  { %819 = vmax.xlane.f32.xlu0 %v818_v10 }
 0x62d   :  { %v2000_v14 = vpop.f32.mrb[20].mxu1 }
 0x62e   :  { %v2002_v15 = vpop.f32.mrb[21].mxu1 }
 0x62f   :  { %v1359_v16 = vpop.f32.mrb[22].mxu1 }
 0x630   :  { %v2004_v17 = vpop.f32.mrb[23].mxu1 }
 0x63d   :  { %v1374_v18 = vpop.f32.mrb[24].mxu1 }
 0x63e   :  { %v811_v21 = vsel %vm332_vm3, %v1374_v18, -1e+30  ;;  %v792_v22 = vpop.f32.mrb[25].mxu1 }
 0x63f   :  { %v809_v23 = vsel %vm332_vm3, %v792_v22, -1e+30  ;;  %v1375_v24 = vpop.f32.mrb[26].mxu1  ;;  %v827_v25 = vsel %vm474_vm4, %v811_v21, -inf }
 0x640   :  { %828 = vmax.xlane.f32.xlu1 %v827_v25  ;;  %v795_v26 = vpop.f32.mrb[27].mxu1  ;;  %v821_v29 = vsel %vm474_vm4, %v809_v23, -inf }
 0x641   :  { %v810_v19 = vsel %vm332_vm3, %v795_v26, -1e+30  ;;  %822 = vmax.xlane.f32.xlu0 %v821_v29 }
 0x642   :  { %v824_v30 = vsel %vm474_vm4, %v810_v19, -inf }
 0x645   :  { %825 = vmax.xlane.f32.xlu0 %v824_v30 }
 0x6b3   :  { %v814_v27 = vpop.xlane.xlu0 %813 }
 0x6b4   :  { %v830_v31 = vsub.f32 %v806_v63, %v814_v27 }
 0x6b5   :  { %v817_v32 = vpop.xlane.xlu1 %816 }
 0x6b6   :  { %v836_v33 = vmul.f32 1.442695, %v830_v31  ;;  %v831_v20 = vsub.f32 %v807_v8, %v817_v32 }
 0x6b7   :  { %v820_v34 = vpop.xlane.xlu0 %819 }
 0x6b8   :  { %1491 = vpow2.f32 %v836_v33  ;;  %v838_v28 = vmul.f32 1.442695, %v831_v20  ;;  %v832_v35 = vsub.f32 %v808_v7, %v820_v34 }
 0x6ba   :  { %1493 = vpow2.f32 %v838_v28  ;;  %v840_v36 = vmul.f32 1.442695, %v832_v35  ;;  %v1453_v35 = vld [vmem:[#allocation10] sm:$0xff]  }
 0x6bc   :  { %1495 = vpow2.f32 %v840_v36  ;;  %v1454_v36 = vld [vmem:[#allocation10 + $0x8] sm:$0xff]  }
 0x6c2   :  { %v1492_v37 = vpop.eup %1491 }
 0x6c3   :  { %v848_v13 = vsel %vm474_vm4, %v1492_v37, 0.0 }
 0x6c4   :  { %v1494_v38 = vpop.eup %1493  ;;  %849 = vadd.xlane.f32.xlu0 %v848_v13 }
 0x6c5   :  { %v851_v39 = vsel %vm474_vm4, %v1494_v38, 0.0 }
 0x6c6   :  { %v1496_v40 = vpop.eup %1495  ;;  %852 = vadd.xlane.f32.xlu1 %v851_v39 }
 0x6c7   :  { %v854_v41 = vsel %vm474_vm4, %v1496_v40, 0.0 }
 0x6c8   :  { %855 = vadd.xlane.f32.xlu0 %v854_v41 }
 0x6cd   :  { %v829_v42 = vpop.xlane.xlu1 %828 }
 0x6ce   :  { %v835_v43 = vsub.f32 %v811_v21, %v829_v42  ;;  %v823_v45 = vpop.xlane.xlu0 %822 }
 0x6cf   :  { %v833_v47 = vsub.f32 %v809_v23, %v823_v45 }
 0x6d0   :  { %v846_v49 = vmul.f32 1.442695, %v835_v43 }
 0x6d1   :  { %v842_v50 = vmul.f32 1.442695, %v833_v47 }
 0x6d2   :  { %1497 = vpow2.f32 %v846_v49  ;;  %v826_v51 = vpop.xlane.xlu0 %825 }
 0x6d3   :  { %v834_v52 = vsub.f32 %v810_v19, %v826_v51  ;;  %1499 = vpow2.f32 %v842_v50 }
 0x6d5   :  { %v844_v53 = vmul.f32 1.442695, %v834_v52 }
 0x6d7   :  { %1501 = vpow2.f32 %v844_v53 }
 0x6dc   :  { %v1498_v54 = vpop.eup %1497 }
 0x6dd   :  { %v863_v57 = vsel %vm474_vm4, %v1498_v54, 0.0  ;;  %v1500_v59 = vpop.eup %1499 }
 0x6de   :  { %864 = vadd.xlane.f32.xlu1 %v863_v57  ;;  %v857_v63 = vsel %vm474_vm4, %v1500_v59, 0.0 }
 0x6e1   :  { %v1502_v62 = vpop.eup %1501 }
 0x6e2   :  { %858 = vadd.xlane.f32.xlu1 %v857_v63  ;;  %v860_v0 = vsel %vm474_vm4, %v1502_v62, 0.0 }
 0x6e3   :  { %861 = vadd.xlane.f32.xlu0 %v860_v0 }
 0x6f3   :  { %884 = vrot.lane.b32.xlu1 %v1883_v48, %s1692_s23 }
 0x6f7   :  { %944 = vrot.lane.b32.xlu1 %v1886_v60, %s1692_s23 }
 0x6f9   :  { %882 = vrot.lane.b32.xlu0 %v1878_v44, %s1692_s23 }
 0x6fb   :  { %946 = vrot.lane.b32.xlu1 %v1891_v61, %s1692_s23 }
 0x751   :  { %v850_v1 = vpop.xlane.xlu0 %849 }
 0x752   :  { %1503 = vrcp.f32 %v850_v1 }
 0x753   :  { %v853_v2 = vpop.xlane.xlu1 %852 }
 0x754   :  { %1505 = vrcp.f32 %v853_v2 }
 0x755   :  { %v856_v18 = vpop.xlane.xlu0 %855 }
 0x756   :  { %1507 = vrcp.f32 %v856_v18 }
 0x75c   :  { %v1504_v7 = vpop.eup %1503 }
 0x75d   :  { %v872_v9 = vmul.f32 %v1504_v7, %v1492_v37 }
 0x75e   :  { %v1506_v8 = vpop.eup %1505 }
 0x75f   :  { %v873_v10 = vmul.f32 %v1506_v8, %v1494_v38 }
 0x760   :  { %v1508_v21 = vpop.eup %1507 }
 0x761   :  { %v878_v16 = vpack.c.bf16 %v873_v10, %v872_v9  ;;  %v874_v23 = vmul.f32 %v1508_v21, %v1496_v40 }
 0x763   :  { %1380 = vmatprep.mubr.msk.bf16.mxu0 %vm474_vm4, %v878_v16  ;;  %v879_v31 = vpack.c.bf16 %v874_v23, %v874_v23 }
 0x76b   :  { %v865_v48 = vpop.xlane.xlu1 %864 }
 0x76c   :  { %1509 = vrcp.f32 %v865_v48 }
 0x76f   :  { %v859_v60 = vpop.xlane.xlu1 %858 }
 0x770   :  { %1511 = vrcp.f32 %v859_v60  ;;  %v862_v44 = vpop.xlane.xlu0 %861 }
 0x771   :  { %1513 = vrcp.f32 %v862_v44 }
 0x773   :  { %v885_v61 = vpop.permute.xlu1 %884 }
 0x774   :  { %v883_v22 = vpop.permute.xlu0 %882  ;;  %v894_v26 = vsel %vm556_vm5, %v885_v61, 0 }
 0x775   :  { %1376 = vmatprep.subr.bf16.mxu0 %v883_v22 }
 0x776   :  { %1377 = vmatpush3.bf16.msra.mxu0 %v883_v22  ;;  %v1510_v25 = vpop.eup %1509 }
 0x777   :  { %1418 = vmatprep.subr.msk.bf16.mxu0 %vm556_vm5, %v885_v61  ;;  %v945_v24 = vpop.permute.xlu1 %944  ;;  %v877_v30 = vmul.f32 %v1510_v25, %v1498_v54 }
 0x778   :  { %1384 = vmatprep.subr.bf16.mxu1 %v945_v24 }
 0x779   :  { %1385 = vmatpush3.bf16.msra.mxu1 %v945_v24  ;;  %v881_v28 = vpack.c.bf16 %v877_v30, %v877_v30 }
 0x77a   :  { %v1512_v29 = vpop.eup %1511  ;;  %1379 = vmatpush3.bf16.msra.mxu0 %v894_v26 }
 0x77b   :  { %v1514_v19 = vpop.eup %1513  ;;  %v947_v27 = vpop.permute.xlu1 %946  ;;  %v875_v32 = vmul.f32 %v1512_v29, %v1500_v59  ;;  %1392 = vmatprep.subr.bf16.mxu0 %v1687_v46 }
 0x77c   :  { %v956_v33 = vsel %vm556_vm5, %v947_v27, 0  ;;  %1419 = vmatprep.subr.msk.bf16.mxu1 %vm556_vm5, %v947_v27  ;;  %v876_v20 = vmul.f32 %v1514_v19, %v1502_v62 }
 0x77d   :  { %1381 = vmatmul.mubr.msk.bf16.vlgmr.msra.gmra.mrb[8].mxu0 %vm474_vm4, %v879_v31  ;;  %1387 = vmatpush3.bf16.msra.mxu1 %v956_v33 }
 0x77e   :  { %v880_v34 = vpack.c.bf16 %v876_v20, %v875_v32  ;;  %1396 = vmatprep.mubr.msk.bf16.mxu0 %vm1688_vm1, %v1687_v46  ;;  %1393 = vmatpush3.bf16.msra.mxu0 %v1453_v35 }
 0x77f   :  { %1394 = vmatprep.subr.bf16.mxu0 %v1687_v46 }
 0x780   :  { %1388 = vmatprep.mubr.msk.bf16.mxu1 %vm474_vm4, %v880_v34 }
 0x781   :  { %1389 = vmatmul.mubr.msk.bf16.vlgmr.msra.gmra.mrb[28].mxu1 %vm474_vm4, %v881_v28 }
 0x782   :  { %1395 = vmatpush3.bf16.msra.mxu0 %v1454_v36 }
 0x850   :  { %v1382_v37 = vpop.f32.mrb[8].mxu0 }
 0x851   :  { %v930_v13 = vpop.f32.mrb[9].mxu0 }
 0x852   :  { %v1383_v38 = vpop.f32.mrb[10].mxu0 }
 0x853   :  { %v933_v39 = vpop.f32.mrb[11].mxu0 }
 0x854   :  { %v1436_v40 = vpack.i.bf16 %v933_v39, %v930_v13  ;;  %v1390_v41 = vpop.f32.mrb[28].mxu1 }
 0x855   :  { %v992_v42 = vpop.f32.mrb[29].mxu1 }
 0x856   :  { %v1441_v43 = vpack.i.bf16 %v992_v42, %v1382_v37  ;;  %1437 = vrot.lane.b32.xlu0 %v1436_v40, %s1693_s24  ;;  %v1391_v45 = vpop.f32.mrb[30].mxu1 }
 0x857   :  { %v995_v47 = vpop.f32.mrb[31].mxu1 }
 0x858   :  { %v1446_v49 = vpack.i.bf16 %v1390_v41, %v995_v47  ;;  %1442 = vrot.lane.b32.xlu1 %v1441_v43, %s1693_s24 }
 0x85a   :  { %1447 = vrot.lane.b32.xlu0 %v1446_v49, %s1693_s24 }
 0x8c8   :  { %v1438_v50 = vpop.permute.xlu0 %1437 }
 0x8c9   :  { %v1440_v51 = vunpack.i.h.bf16 %v1438_v50  ;;  %v1439_v52 = vunpack.i.l.bf16 %v1438_v50 }
 0x8ca   :  { %v1443_v53 = vpop.permute.xlu1 %1442 }
 0x8cb   :  { %v1031_v54 = vsel %vm339_vm2, %v1989_v58, %v1440_v51  ;;  %v1030_v57 = vsel %vm339_vm2, %v1987_v56, %v1439_v52  ;;  %v1445_v59 = vunpack.i.h.bf16 %v1443_v53  ;;  %v1444_v62 = vunpack.i.l.bf16 %v1443_v53 }
 0x8cc   :  { %v1036_v63 = vpack.c.bf16 %v1031_v54, %v1030_v57  ;;  %v1448_v0 = vpop.permute.xlu0 %1447 }
 0x8cd   :  { %v1033_v1 = vsel %vm339_vm2, %v2002_v15, %v1445_v59  ;;  %v1032_v2 = vsel %vm339_vm2, %v1985_v55, %v1444_v62  ;;  %v1450_v7 = vunpack.i.h.bf16 %v1448_v0  ;;  %v1449_v8 = vunpack.i.l.bf16 %v1448_v0  ;;  %v1239_v55 = vld [vmem:[#allocation11] ss:$0 sm:$0xff] }
 0x8ce   :  { %v1249_v9 = vpack.c.bf16 %v1033_v1, %v1032_v2  ;;  %1397 = vmatmul.mubr.msk.bf16.vlgmr.msra.gmra.mrb[12].mxu0 %vm115_vm0, %v1036_v63  ;;  %v1145_v26 = vadd.f32 %v1817_v6, %v1239_v55  ;;  %v1146_v33 = vadd.f32 %v1827_v11, %v1239_v55 }
 0x8cf   :  { %v1035_v58 = vsel %vm339_vm2, %v2000_v14, %v1450_v7  ;;  %v1034_v56 = vsel %vm339_vm2, %v2004_v17, %v1449_v8  ;;  %1400 = vmatprep.mubr.msk.bf16.mxu0 %vm1688_vm1, %v1687_v46  ;;  %v1142_v14 = vadd.f32 %v1811_v3, %v1239_v55  ;;  %v1143_v17 = vadd.f32 %v1815_v5, %v1239_v55 }
 0x8d0   :  { %v1039_v10 = vpack.c.bf16 %v1035_v58, %v1035_v58  ;;  %v1038_v16 = vpack.c.bf16 %v1034_v56, %v1033_v1 }
 0x8d2   :  { %v1049_v15 = vunpack.c.l.b16 %v1039_v10  ;;  %v1048_v18 = vunpack.c.h.b16 %v1038_v16 }
 0x8d4   :  { %v1056_v48 = vpack.c.b16 %v1049_v15, %v1048_v18 }
 0x8d6   :  { %1401 = vmatmul.mubr.msk.bf16.gmra.mrb[16].mxu0 %vm115_vm0, %v1249_v9 }
 0x8d7   :  { %1404 = vmatprep.mubr.msk.bf16.mxu0 %vm1688_vm1, %v1687_v46  ;;  %v1144_v46 = vadd.f32 %v1813_v4, %v1239_v55  ;;  %v1147_v4 = vadd.f32 %v1829_v12, %v1239_v55 }
 0x8de   :  { %1405 = vmatmul.mubr.msk.bf16.gmra.mrb[20].mxu0 %vm115_vm0, %v1056_v48 }
 0x9a1   :  { %v1112_v60 = vpop.f32.mrb[12].mxu0 }
 0x9a2   :  { %v1148_v44 = vadd.f32 %v1142_v14, %v1112_v60  ;;  %v1398_v61 = vpop.f32.mrb[13].mxu0 }
 0x9a3   :  { %v1115_v21 = vpop.f32.mrb[14].mxu0 }
 0x9a4   :  { %v1250_v22 = vpack.c.bf16 %v1148_v44, %v1148_v44  ;;  %v1149_v23 = vadd.f32 %v1143_v17, %v1115_v21  ;;  %v1399_v24 = vpop.f32.mrb[15].mxu0 }
 0x9a6   :  { %1181 = vst.msk [vmem:[#allocation13] sm:$0xf] %vm1180_vm6, %v1250_v22  ;;  %v1251_v25 = vpack.c.bf16 %v1149_v23, %v1149_v23 }
 0x9a8   :  { %1182 = vst.msk [vmem:[#allocation13 + $0x4] sm:$0xf] %vm1180_vm6, %v1251_v25 }
 0x9a9   :  { %v1120_v3 = vpop.f32.mrb[16].mxu0 }
 0x9aa   :  { %v1150_v29 = vadd.f32 %v1144_v46, %v1120_v3  ;;  %v1402_v5 = vpop.f32.mrb[17].mxu0 }
 0x9ab   :  { %v1123_v19 = vpop.f32.mrb[18].mxu0 }
 0x9ac   :  { %v1252_v30 = vpack.c.bf16 %v1150_v29, %v1150_v29  ;;  %v1151_v27 = vadd.f32 %v1145_v26, %v1123_v19  ;;  %v1403_v31 = vpop.f32.mrb[19].mxu0 }
 0x9ae   :  { %1183 = vst.msk [vmem:[#allocation13 + $0x8] sm:$0xf] %vm1180_vm6, %v1252_v30  ;;  %v1253_v32 = vpack.c.bf16 %v1151_v27, %v1151_v27 }
 0x9b0   :  { %1184 = vst.msk [vmem:[#allocation13 + $0xc] sm:$0xf] %vm1180_vm6, %v1253_v32 }
 0x9b1   :  { %v1128_v20 = vpop.f32.mrb[20].mxu0 }
 0x9b2   :  { %v1152_v34 = vadd.f32 %v1146_v33, %v1128_v20  ;;  %v1406_v28 = vpop.f32.mrb[21].mxu0 }
 0x9b3   :  { %v1131_v6 = vpop.f32.mrb[22].mxu0 }
 0x9b4   :  { %v1254_v35 = vpack.c.bf16 %v1152_v34, %v1152_v34  ;;  %v1153_v36 = vadd.f32 %v1147_v4, %v1131_v6  ;;  %v1407_v37 = vpop.f32.mrb[23].mxu0 }
 0x9b6   :  { %1185 = vst.msk [vmem:[#allocation13 + $0x10] sm:$0xf] %vm1180_vm6, %v1254_v35  ;;  %v1255_v13 = vpack.c.bf16 %v1153_v36, %v1153_v36 }
 0x9b8   :  { %1186 = vst.msk [vmem:[#allocation13 + $0x14] sm:$0xf] %vm1180_vm6, %v1255_v13 }
 0x9b9   :  { %1658 = shalt.err (!%p1655_p10)
}
 0x9ba   :  { %s1659_s30 = scalar_lea.hbm %s2089_s6, 384 }
 0x9bb   :  { %p1660_p11 = scmp.ne.s32.totalorder %s2089_s6, %s1659_s30  ;;  %p1663_p12 = scmp.lt.u32.totalorder %s1659_s30, %s2089_s6 }
 0x9bd   :  { %p1665_p13 = pnand %p1663_p12, %p1660_p11 }
 0x9bf   :  { %1668 = shalt.err (!%p1665_p13)
}
 0x9c0   :  { %1198 = dma.vmem_to_hbm [thread:$0]  %s1193_s26, 384, %s2089_s6, [#allocation4], %s1682_s21, %s1682_s21, %s1683_s22  }
 0x9c1   :  { %1677 = dma.done.wait [#allocation4], 384  }
 0x9c2   :  { %1678 = vsyncadd [#allocation4], 4294966912 }
 0x9c3   :  { %1202 = vsyncpa [#allocation3], 1 }
 0x9c4   :  { %1203 = vsyncpa [#allocation6], 1 }
 0x9c5   :  { %1204 = vsyncpa [#allocation9], 1 }
 0x9c6   :  { %1205 = vsyncpa [#allocation12], 1 }
 0x9c7   :  { %1206 = vsyncpa [#allocation4], 1 }

// kernel: vit_forward.11
= control target key start
LH: loop header
LB: loop body
LE: loop exit
PB: predicated region body
PF: predicated region fallthrough
CT: control target
= control target key end

     0   :  { %vm26_vm0 = vcmask 254976   ;;  %s249_s0 = inlined_call_operand.vmem [shape: bf16[2,32], index: 0, kind: input, shape index: {}]   ;;  %s250_s1 = inlined_call_operand.vmem [shape: f32[1,32], index: 1, kind: input, shape index: {}]   ;;  %s251_s2 = inlined_call_operand.vmem [shape: f32[1,32], index: 2, kind: input, shape index: {}]   ;;  %s252_s3 = inlined_call_operand.vmem [shape: bf16[32,128], index: 3, kind: input, shape index: {}]   ;;  %s253_s4 = inlined_call_operand.vmem [shape: f32[1,128], index: 4, kind: input, shape index: {}]   ;;  %s254_s5 = inlined_call_operand.hbm [shape: f32[2,128], index: 5, kind: output, shape index: {}]  }
   0x1   :  { %v22_v0 = vld [vmem:[%s249_s0] sm:$0x1] }
   0x2   :  { %v25_v1 = vunpack.c.l.bf16 %v22_v0 }
   0x3   :  { %10 = vsyncpa [#allocation3], 0  ;;  %v158_v8 = vld [vmem:[%s252_s3] sm:$0xff]   ;;  %v186_v9 = vmov 0.0   ;;  %v159_v10 = vld [vmem:[%s252_s3 + $0x8] sm:$0xff]   ;;  %vm187_vm1 = vmmov 0  }
   0x4   :  { %v27_v2 = vsel %vm26_vm0, %v25_v1, 0.0  ;;  %147 = vmatprep.subr.bf16.mxu0 %v186_v9  ;;  %151 = vmatprep.mubr.msk.bf16.mxu0 %vm187_vm1, %v186_v9  ;;  %v138_v15 = vld [vmem:[%s250_s1] ss:$0 sm:$0xff]  ;;  %vm79_vm2 = vcmask 261120   ;;  %s188_s28 = smov [#allocation2]  }
   0x5   :  { %28 = vadd.xlane.f32.xlu0 %v27_v2  ;;  %148 = vmatpush3.bf16.msra.mxu0 %v158_v8  ;;  %v139_v17 = vld [vmem:[%s251_s2] ss:$0 sm:$0xff]  ;;  %s130_s29 = sshll.u32 %s188_s28, 4  ;;  %s131_s29 = int_to_ptr.vmem [resolvable:$true] %s130_s29 }
   0x6   :  { %149 = vmatprep.subr.bf16.mxu0 %v186_v9  ;;  %v140_v21 = vld [vmem:[%s253_s4] ss:$0 sm:$0xff]  ;;  %s162_s1 = scalar_lea.vmem %s131_s29, 32  ;;  %p167_p1 = scmp.lt.s32.totalorder %s131_s29, %s131_s29 }
   0x7   :  { %p163_p0 = scmp.ne.s32.totalorder %s131_s29, %s162_s1  ;;  %p168_p2 = scmp.lt.s32.totalorder %s162_s1, %s162_s1 }
   0x9   :  { %150 = vmatpush3.bf16.msra.mxu0 %v159_v10  ;;  %p169_p3 = por %p168_p2, %p167_p1 }
   0xb   :  { %p170_p4 = pnand %p169_p3, %p163_p0 }
  0x92   :  { %v29_v3 = vpop.xlane.xlu0 %28 }
  0x93   :  { %v31_v4 = vmul.f32 0.03125, %v29_v3 }
  0x95   :  { %v32_v5 = vsub.f32 %v25_v1, %v31_v4 }
  0x97   :  { %v33_v6 = vmul.f32 %v32_v5, %v32_v5 }
  0x99   :  { %v34_v7 = vsel %vm26_vm0, %v33_v6, 0.0 }
  0x9a   :  { %35 = vadd.xlane.f32.xlu0 %v34_v7 }
 0x127   :  { %v36_v11 = vpop.xlane.xlu0 %35 }
 0x128   :  { %v37_v12 = vmul.f32 0.03125, %v36_v11 }
 0x12a   :  { %v38_v13 = vadd.f32 1e-05, %v37_v12 }
 0x12c   :  { %160 = vrsqrt.f32 %v38_v13 }
 0x136   :  { %v161_v14 = vpop.eup %160 }
 0x137   :  { %v40_v16 = vmul.f32 %v161_v14, %v32_v5 }
 0x139   :  { %v47_v18 = vmul.f32 %v138_v15, %v40_v16 }
 0x13b   :  { %v54_v19 = vadd.f32 %v139_v17, %v47_v18 }
 0x13d   :  { %v55_v20 = vpack.c.bf16 %v54_v19, %v54_v19 }
 0x13f   :  { %152 = vmatmul.mubr.msk.bf16.vlgmr.msra.gmra.mrb[0].mxu0 %vm79_vm2, %v55_v20 }
 0x212   :  { %v117_v22 = vpop.f32.mrb[0].mxu0 }
 0x213   :  { %v118_v23 = vadd.f32 %v140_v21, %v117_v22  ;;  %v153_v24 = vpop.f32.mrb[1].mxu0 }
 0x214   :  { %v120_v25 = vpop.f32.mrb[2].mxu0 }
 0x215   :  { %123 = vst [vmem:[#allocation2] sm:$0x3] %v118_v23  ;;  %v154_v26 = vpop.f32.mrb[3].mxu0 }
 0x216   :  { %173 = shalt.err (!%p170_p4)
}
 0x217   :  { %s174_s4 = scalar_lea.hbm %s254_s5, 32 }
 0x218   :  { %p175_p5 = scmp.ne.s32.totalorder %s254_s5, %s174_s4  ;;  %p178_p6 = scmp.lt.u32.totalorder %s174_s4, %s254_s5 }
 0x21a   :  { %p180_p7 = pnand %p178_p6, %p175_p5 }
 0x21c   :  { %183 = shalt.err (!%p180_p7)
}
 0x21d   :  { %133 = dma.vmem_to_hbm [thread:$0]  %s131_s29, 32, %s254_s5, [#allocation3]  }
 0x21e   :  { %184 = dma.done.wait [#allocation3], 32  }
 0x21f   :  { %185 = vsyncadd [#allocation3], 4294967264 }
 0x220   :  { %137 = vsyncpa [#allocation3], 1 }

</bundles_post_ra>
